<compile_context>
chip_gen: v5e
topology: v5e:2x2
jax: 0.10.0
libtpu: 0.0.40
codegen_flags: <defaults>
</compile_context>

<pallas_src>
import numpy as np
import jax
import jax.numpy as jnp
from jax import lax
from jax.experimental import pallas as pl
from jax.experimental.pallas import tpu as pltpu


def _silu(x):
    return x * jax.nn.sigmoid(x)


# ----------------------------------------------------------------------------
# Fused CSPStage kernel (one grid step = one image)
# ----------------------------------------------------------------------------
def _make_csp_kernel(n, H, W, cin, cmid, cout):
    HW = H * W
    PADW = W + 1              # zero halo on each side of the flat spatial axis
    BUFW = HW + 2 * PADW

    def kernel(x_ref, w12_ref, b12_ref, *rest):
        blk_refs = rest[:4 * n]
        w3_ref, b3_ref, o_ref, buf_ref = rest[4 * n:]

        # Zero the flat padded scratch once per image.  Only its interior is
        # rewritten by every 3x3 conv below, so the halo stays zero for all
        # 2*n convs of this image.
        buf_ref[...] = jnp.zeros(buf_ref.shape, buf_ref.dtype)

        # Column-validity masks for the horizontal taps of a 3x3 conv.
        # Computed once per image, reused by all 2*n 3x3 convs.
        col = lax.broadcasted_iota(jnp.int32, (1, HW), 1)
        if W & (W - 1) == 0:
            wpos = jnp.bitwise_and(col, W - 1)
        else:
            wpos = col % W
        mask_l = jnp.where(wpos >= 1, 1.0, 0.0).astype(jnp.float32)       # dx=-1
        mask_r = jnp.where(wpos <= W - 2, 1.0, 0.0).astype(jnp.float32)   # dx=+1

        def conv3x3(y_flat, w9_ref, b_ref):
            # y_flat: (cmid, HW) channels-first.  Build the (9*cmid, HW) im2col
            # patch matrix from 9 statically shifted views of the zero-padded
            # flat line, then a single K=9*cmid MXU matmul.
            buf_ref[:, PADW:PADW + HW] = y_flat
            taps = []
            for dy in (-1, 0, 1):
                for dx in (-1, 0, 1):
                    off = PADW + dy * W + dx          # static lane offset
                    t = buf_ref[:, off:off + HW]
                    if dx == -1:
                        t = t * mask_l
                    elif dx == 1:
                        t = t * mask_r
                    taps.append(t)
            patches = jnp.concatenate(taps, axis=0)   # (9*cmid, HW), sublane cat
            acc = jnp.dot(w9_ref[...], patches,
                          preferred_element_type=jnp.float32)
            return acc + b_ref[...]

        x_flat = x_ref[0]                             # (cin, HW)

        # conv1 + conv2 fused into one 1x1 matmul, lane-dense output.
        y12 = _silu(jnp.dot(w12_ref[...], x_flat,
                            preferred_element_type=jnp.float32) + b12_ref[...])
        y1 = y12[:cmid]
        y2 = y12[cmid:]

        mids = [y1]
        for i in range(n):
            rep_w, rep_b, c1_w, c1_b = blk_refs[4 * i:4 * i + 4]
            # RepVGGBlock (3x3 + 1x1 branches pre-folded into one 3x3) + swish
            t = _silu(conv3x3(y2, rep_w, rep_b))
            # ConvBN 3x3 + swish
            t = _silu(conv3x3(t, c1_w, c1_b))
            y2 = y2 + t                               # shortcut
            mids.append(y2)

        # conv3 (1x1 on the channel concat) — concat stays in vregs.
        cat = jnp.concatenate(mids, axis=0)           # ((n+1)*cmid, HW)
        out = _silu(jnp.dot(w3_ref[...], cat,
                            preferred_element_type=jnp.float32) + b3_ref[...])
        o_ref[...] = out.reshape(1, cout, HW).astype(o_ref.dtype)

    return kernel, BUFW


def csp_stage_pallas(x, kp):
    # x: (N, ch_in, H, W)  — NCHW, same layout as the PyTorch module.
    N, cin, H, W = x.shape
    n, cmid, cout = kp['n'], kp['cmid'], kp['cout']
    HW = H * W
    x3 = x.reshape(N, cin, HW)

    weight_arrays = [kp['w12'], kp['b12']]
    for b in kp['blocks']:
        weight_arrays += [b['rep_w'], b['rep_b'], b['c1_w'], b['c1_b']]
    weight_arrays += [kp['w3'], kp['b3']]

    kernel, bufw = _make_csp_kernel(n, H, W, cin, cmid, cout)

    in_specs = [pl.BlockSpec((1, cin, HW), lambda nidx: (nidx, 0, 0))]
    in_specs += [pl.BlockSpec(a.shape, lambda nidx: (0, 0))
                 for a in weight_arrays]

    out = pl.pallas_call(
        kernel,
        out_shape=jax.ShapeDtypeStruct((N, cout, HW), jnp.float32),
        grid=(N,),
        in_specs=in_specs,
        out_specs=pl.BlockSpec((1, cout, HW), lambda nidx: (nidx, 0, 0)),
        scratch_shapes=[pltpu.VMEM((cmid, bufw), jnp.float32)],
        compiler_params=pltpu.CompilerParams(
            dimension_semantics=("parallel",)),       # shards batch on v7x TCs
    )(x3, *weight_arrays)
    return out.reshape(N, cout, H, W)


# ----------------------------------------------------------------------------
# Parameter construction (deterministic, synthetic).  BN folded in eval mode.
# Weights kept in HWIO for the reference; packed/transposed for the kernel.
# ----------------------------------------------------------------------------
def make_convbn_params(key, cin, cout, k):
    kw, kg, kb, km, kv = jax.random.split(key, 5)
    w = jax.random.normal(kw, (k, k, cin, cout), jnp.float32)
    w = w * (1.0 / np.sqrt(cin * k * k))
    gamma = 1.0 + 0.1 * jax.random.normal(kg, (cout,), jnp.float32)
    beta = 0.1 * jax.random.normal(kb, (cout,), jnp.float32)
    mean = 0.1 * jax.random.normal(km, (cout,), jnp.float32)
    var = jax.random.uniform(kv, (cout,), jnp.float32, minval=0.5, maxval=1.5)
    scale = gamma / jnp.sqrt(var + 1e-5)              # BN eval-mode fold
    return w * scale[None, None, None, :], beta - mean * scale


def make_cspstage_params(key, ch_in, ch_out, n):
    ch_mid = ch_out // 2
    keys = jax.random.split(key, 3 + 3 * n)
    p = {'n': n, 'ch_in': ch_in, 'ch_out': ch_out, 'ch_mid': ch_mid}
    p['conv1_w'], p['conv1_b'] = make_convbn_params(keys[0], ch_in, ch_mid, 1)
    p['conv2_w'], p['conv2_b'] = make_convbn_params(keys[1], ch_in, ch_mid, 1)
    blocks = []
    for i in range(n):
        k3, k1, kc = keys[2 + 3 * i], keys[3 + 3 * i], keys[4 + 3 * i]
        rep_w3, rep_b3 = make_convbn_params(k3, ch_mid, ch_mid, 3)
        rep_w1, rep_b1 = make_convbn_params(k1, ch_mid, ch_mid, 1)
        c1_w, c1_b = make_convbn_params(kc, ch_mid, ch_mid, 3)
        blocks.append(dict(rep_w3=rep_w3, rep_b3=rep_b3,
                           rep_w1=rep_w1, rep_b1=rep_b1,
                           c1_w=c1_w, c1_b=c1_b))
    p['blocks'] = blocks
    p['conv3_w'], p['conv3_b'] = make_convbn_params(
        keys[-1], ch_mid * (n + 1), ch_out, 1)
    return p


def pack_kernel_params(p):
    """Convert HWIO/eval-folded params to the fused channels-first kernel layout."""
    cm = p['ch_mid']

    def t1x1(w):                       # (1,1,ci,co) -> (co, ci)
        return jnp.transpose(w[0, 0])

    def t3x3(w):                       # (3,3,ci,co) -> (co, 9*ci), (ky,kx,ci) order
        ci, co = w.shape[2], w.shape[3]
        return jnp.transpose(w.reshape(9 * ci, co))

    kp = {'n': p['n'], 'cmid': cm, 'cout': p['ch_out']}
    kp['w12'] = jnp.concatenate([t1x1(p['conv1_w']), t1x1(p['conv2_w'])], axis=0)
    kp['b12'] = jnp.concatenate([p['conv1_b'], p['conv2_b']]).reshape(2 * cm, 1)
    blocks = []
    for b in p['blocks']:
        # RepVGG reparameterization: fold the 1x1 branch into the 3x3 center tap.
        w_fused = b['rep_w3'].at[1, 1].add(b['rep_w1'][0, 0])
        b_fused = b['rep_b3'] + b['rep_b1']
        blocks.append(dict(rep_w=t3x3(w_fused), rep_b=b_fused.reshape(cm, 1),
                           c1_w=t3x3(b['c1_w']), c1_b=b['c1_b'].reshape(cm, 1)))
    kp['blocks'] = blocks
    kp['w3'] = t1x1(p['conv3_w'])
    kp['b3'] = p['conv3_b'].reshape(p['ch_out'], 1)
    return kp


# ----------------------------------------------------------------------------
# Pure-JAX reference (RepVGG branches computed separately, like the PyTorch code)
# ----------------------------------------------------------------------------
def _convbn_ref(x, w, b, act=True):
    k = w.shape[0]
    pad = k // 2
    y = lax.conv_general_dilated(
        x, w, window_strides=(1, 1), padding=[(pad, pad), (pad, pad)],
        dimension_numbers=('NCHW', 'HWIO', 'NCHW'))
    y = y + b.reshape(1, -1, 1, 1)
    return _silu(y) if act else y


def csp_stage_ref(x, p):
    y1 = _convbn_ref(x, p['conv1_w'], p['conv1_b'])
    y2 = _convbn_ref(x, p['conv2_w'], p['conv2_b'])
    mid_out = [y1]
    for b in p['blocks']:
        t = (_convbn_ref(y2, b['rep_w3'], b['rep_b3'], act=False)
             + _convbn_ref(y2, b['rep_w1'], b['rep_b1'], act=False))
        t = _silu(t)
        t = _convbn_ref(t, b['c1_w'], b['c1_b'])
        y2 = y2 + t
        mid_out.append(y2)
    y = jnp.concatenate(mid_out, axis=1)
    return _convbn_ref(y, p['conv3_w'], p['conv3_b'])


# ----------------------------------------------------------------------------
if __name__ == "__main__":
    key = jax.random.PRNGKey(0)
    kx, kparam = jax.random.split(key)

    N, H, W = 2, 16, 16
    ch_in, ch_out, n = 16, 16, 2

    x = jax.random.normal(kx, (N, ch_in, H, W), jnp.float32)   # NCHW like PyTorch
    params = make_cspstage_params(kparam, ch_in, ch_out, n)
    kparams = pack_kernel_params(params)

    out = jax.block_until_ready(csp_stage_pallas(x, kparams))
    ref = jax.block_until_ready(csp_stage_ref(x, params))

    np.testing.assert_allclose(np.asarray(out), np.asarray(ref),
                               rtol=2e-4, atol=2e-4)
    assert out.shape == (N, ch_out, H, W)
    print("KERNEL_OK")
</pallas_src>

<mosaic_0001>
module attributes {stable_mosaic.version = 11 : i64} {
  func.func @kernel(%arg0: i32, %arg1: memref<1x16x256xf32, #tpu.memory_space<vmem>>, %arg2: memref<16x16xf32, #tpu.memory_space<vmem>>, %arg3: memref<16x1xf32, #tpu.memory_space<vmem>>, %arg4: memref<8x72xf32, #tpu.memory_space<vmem>>, %arg5: memref<8x1xf32, #tpu.memory_space<vmem>>, %arg6: memref<8x72xf32, #tpu.memory_space<vmem>>, %arg7: memref<8x1xf32, #tpu.memory_space<vmem>>, %arg8: memref<8x72xf32, #tpu.memory_space<vmem>>, %arg9: memref<8x1xf32, #tpu.memory_space<vmem>>, %arg10: memref<8x72xf32, #tpu.memory_space<vmem>>, %arg11: memref<8x1xf32, #tpu.memory_space<vmem>>, %arg12: memref<16x24xf32, #tpu.memory_space<vmem>>, %arg13: memref<16x1xf32, #tpu.memory_space<vmem>>, %arg14: memref<1x16x256xf32, #tpu.memory_space<vmem>>, %arg15: memref<8x290xf32, #tpu.memory_space<vmem>>) attributes {dimension_semantics = [#tpu.dimension_semantics<parallel>], iteration_bounds = array<i64: 2>, scalar_prefetch = 0 : i64, scratch_operands = 1 : i64, tpu.core_type = #tpu.core_type<tc>, window_params = [{transform_indices = @transform_0, window_bounds = array<i64: 1, 16, 256>}, {pipeline_mode = #tpu.pipeline_mode<synchronous>, transform_indices = @transform_1, window_bounds = array<i64: 16, 16>}, {pipeline_mode = #tpu.pipeline_mode<synchronous>, transform_indices = @transform_2, window_bounds = array<i64: 16, 1>}, {pipeline_mode = #tpu.pipeline_mode<synchronous>, transform_indices = @transform_3, window_bounds = array<i64: 8, 72>}, {pipeline_mode = #tpu.pipeline_mode<synchronous>, transform_indices = @transform_4, window_bounds = array<i64: 8, 1>}, {pipeline_mode = #tpu.pipeline_mode<synchronous>, transform_indices = @transform_5, window_bounds = array<i64: 8, 72>}, {pipeline_mode = #tpu.pipeline_mode<synchronous>, transform_indices = @transform_6, window_bounds = array<i64: 8, 1>}, {pipeline_mode = #tpu.pipeline_mode<synchronous>, transform_indices = @transform_7, window_bounds = array<i64: 8, 72>}, {pipeline_mode = #tpu.pipeline_mode<synchronous>, transform_indices = @transform_8, window_bounds = array<i64: 8, 1>}, {pipeline_mode = #tpu.pipeline_mode<synchronous>, transform_indices = @transform_9, window_bounds = array<i64: 8, 72>}, {pipeline_mode = #tpu.pipeline_mode<synchronous>, transform_indices = @transform_10, window_bounds = array<i64: 8, 1>}, {pipeline_mode = #tpu.pipeline_mode<synchronous>, transform_indices = @transform_11, window_bounds = array<i64: 16, 24>}, {pipeline_mode = #tpu.pipeline_mode<synchronous>, transform_indices = @transform_12, window_bounds = array<i64: 16, 1>}, {transform_indices = @transform_13, window_bounds = array<i64: 1, 16, 256>}]} {
    %cst = arith.constant 0.000000e+00 : f32
    %0 = vector.broadcast %cst : f32 to vector<8x290xf32>
    %c0 = arith.constant 0 : index
    %c0_0 = arith.constant 0 : index
    %1 = vector.load %arg15[%c0, %c0_0] : memref<8x290xf32, #tpu.memory_space<vmem>>, vector<8x290xf32>
    tpu.vector_store %arg15[%c0, %c0_0], %0 {strides = array<i32>} : memref<8x290xf32, #tpu.memory_space<vmem>>, vector<8x290xf32>,
    %2 = tpu.iota {dimensions = array<i32: 1>} : vector<1x256xi32>
    %c15_i32 = arith.constant 15 : i32
    %3 = vector.broadcast %c15_i32 : i32 to vector<1x256xi32>
    %4 = arith.andi %2, %3 : vector<1x256xi32>
    %c1_i32 = arith.constant 1 : i32
    %5 = vector.broadcast %c1_i32 : i32 to vector<1x256xi32>
    %6 = arith.cmpi sge, %4, %5 : vector<1x256xi32>
    %cst_1 = arith.constant 1.000000e+00 : f32
    %cst_2 = arith.constant 0.000000e+00 : f32
    %7 = vector.broadcast %cst_1 : f32 to vector<1x256xf32>
    %8 = vector.broadcast %cst_2 : f32 to vector<1x256xf32>
    %9 = arith.select %6, %7, %8 : vector<1x256xi1>, vector<1x256xf32>
    %c14_i32 = arith.constant 14 : i32
    %10 = vector.broadcast %c14_i32 : i32 to vector<1x256xi32>
    %11 = arith.cmpi sle, %4, %10 : vector<1x256xi32>
    %cst_3 = arith.constant 1.000000e+00 : f32
    %cst_4 = arith.constant 0.000000e+00 : f32
    %12 = vector.broadcast %cst_3 : f32 to vector<1x256xf32>
    %13 = vector.broadcast %cst_4 : f32 to vector<1x256xf32>
    %14 = arith.select %11, %12, %13 : vector<1x256xi1>, vector<1x256xf32>
    %c0_5 = arith.constant 0 : index
    %c0_6 = arith.constant 0 : index
    %c0_7 = arith.constant 0 : index
    %15 = vector.load %arg1[%c0_5, %c0_6, %c0_7] : memref<1x16x256xf32, #tpu.memory_space<vmem>>, vector<1x16x256xf32>
    %16 = vector.shape_cast %15 : vector<1x16x256xf32> to vector<16x256xf32>
    %c0_8 = arith.constant 0 : index
    %c0_9 = arith.constant 0 : index
    %17 = vector.load %arg2[%c0_8, %c0_9] : memref<16x16xf32, #tpu.memory_space<vmem>>, vector<16x16xf32>
    %cst_10 = arith.constant dense<0.000000e+00> : vector<16x256xf32>
    %18 = tpu.matmul %17, %16, %cst_10 {dimension_numbers = #tpu.dot_dimension_numbers<[1], [0], [0], [1], [0, 0, 1, 1], [], []>} : vector<16x16xf32>, vector<16x256xf32>, vector<16x256xf32> -> vector<16x256xf32>
    %c0_11 = arith.constant 0 : index
    %c0_12 = arith.constant 0 : index
    %19 = vector.load %arg3[%c0_11, %c0_12] : memref<16x1xf32, #tpu.memory_space<vmem>>, vector<16x1xf32>
    %20 = vector.broadcast %19 : vector<16x1xf32> to vector<16x256xf32>
    %21 = arith.addf %18, %20 : vector<16x256xf32>
    %22 = arith.negf %21 : vector<16x256xf32>
    %23 = math.exp %22 : vector<16x256xf32>
    %cst_13 = arith.constant 1.000000e+00 : f32
    %24 = vector.broadcast %cst_13 : f32 to vector<16x256xf32>
    %25 = arith.addf %24, %23 : vector<16x256xf32>
    %26 = arith.divf %24, %25 : vector<16x256xf32>
    %27 = arith.mulf %21, %26 : vector<16x256xf32>
    %28 = vector.extract_strided_slice %27 {offsets = [0, 0], sizes = [8, 256], strides = [1, 1]} : vector<16x256xf32> to vector<8x256xf32>
    %29 = vector.extract_strided_slice %27 {offsets = [8, 0], sizes = [8, 256], strides = [1, 1]} : vector<16x256xf32> to vector<8x256xf32>
    %c0_14 = arith.constant 0 : index
    %c17 = arith.constant 17 : index
    %30 = vector.load %arg15[%c0_14, %c17] : memref<8x290xf32, #tpu.memory_space<vmem>>, vector<8x256xf32>
    tpu.vector_store %arg15[%c0_14, %c17], %29 {strides = array<i32>} : memref<8x290xf32, #tpu.memory_space<vmem>>, vector<8x256xf32>,
    %c0_15 = arith.constant 0 : index
    %c0_16 = arith.constant 0 : index
    %31 = vector.load %arg15[%c0_15, %c0_16] : memref<8x290xf32, #tpu.memory_space<vmem>>, vector<8x256xf32>
    %32 = vector.broadcast %9 : vector<1x256xf32> to vector<8x256xf32>
    %33 = arith.mulf %31, %32 : vector<8x256xf32>
    %c0_17 = arith.constant 0 : index
    %c1 = arith.constant 1 : index
    %34 = vector.load %arg15[%c0_17, %c1] : memref<8x290xf32, #tpu.memory_space<vmem>>, vector<8x256xf32>
    %c0_18 = arith.constant 0 : index
    %c2 = arith.constant 2 : index
    %35 = vector.load %arg15[%c0_18, %c2] : memref<8x290xf32, #tpu.memory_space<vmem>>, vector<8x256xf32>
    %36 = vector.broadcast %14 : vector<1x256xf32> to vector<8x256xf32>
    %37 = arith.mulf %35, %36 : vector<8x256xf32>
    %c0_19 = arith.constant 0 : index
    %c16 = arith.constant 16 : index
    %38 = vector.load %arg15[%c0_19, %c16] : memref<8x290xf32, #tpu.memory_space<vmem>>, vector<8x256xf32>
    %39 = vector.broadcast %9 : vector<1x256xf32> to vector<8x256xf32>
    %40 = arith.mulf %38, %39 : vector<8x256xf32>
    %c0_20 = arith.constant 0 : index
    %c17_21 = arith.constant 17 : index
    %41 = vector.load %arg15[%c0_20, %c17_21] : memref<8x290xf32, #tpu.memory_space<vmem>>, vector<8x256xf32>
    %c0_22 = arith.constant 0 : index
    %c18 = arith.constant 18 : index
    %42 = vector.load %arg15[%c0_22, %c18] : memref<8x290xf32, #tpu.memory_space<vmem>>, vector<8x256xf32>
    %43 = vector.broadcast %14 : vector<1x256xf32> to vector<8x256xf32>
    %44 = arith.mulf %42, %43 : vector<8x256xf32>
    %c0_23 = arith.constant 0 : index
    %c32 = arith.constant 32 : index
    %45 = vector.load %arg15[%c0_23, %c32] : memref<8x290xf32, #tpu.memory_space<vmem>>, vector<8x256xf32>
    %46 = vector.broadcast %9 : vector<1x256xf32> to vector<8x256xf32>
    %47 = arith.mulf %45, %46 : vector<8x256xf32>
    %c0_24 = arith.constant 0 : index
    %c33 = arith.constant 33 : index
    %48 = vector.load %arg15[%c0_24, %c33] : memref<8x290xf32, #tpu.memory_space<vmem>>, vector<8x256xf32>
    %c0_25 = arith.constant 0 : index
    %c34 = arith.constant 34 : index
    %49 = vector.load %arg15[%c0_25, %c34] : memref<8x290xf32, #tpu.memory_space<vmem>>, vector<8x256xf32>
    %50 = vector.broadcast %14 : vector<1x256xf32> to vector<8x256xf32>
    %51 = arith.mulf %49, %50 : vector<8x256xf32>
    %52 = tpu.concatenate %33, %34, %37, %40, %41, %44, %47, %48, %51 in 0 : vector<8x256xf32>, vector<8x256xf32>, vector<8x256xf32>, vector<8x256xf32>, vector<8x256xf32>, vector<8x256xf32>, vector<8x256xf32>, vector<8x256xf32>, vector<8x256xf32> -> vector<72x256xf32>
    %c0_26 = arith.constant 0 : index
    %c0_27 = arith.constant 0 : index
    %53 = vector.load %arg4[%c0_26, %c0_27] : memref<8x72xf32, #tpu.memory_space<vmem>>, vector<8x72xf32>
    %cst_28 = arith.constant dense<0.000000e+00> : vector<8x256xf32>
    %54 = tpu.matmul %53, %52, %cst_28 {dimension_numbers = #tpu.dot_dimension_numbers<[1], [0], [0], [1], [0, 0, 1, 1], [], []>} : vector<8x72xf32>, vector<72x256xf32>, vector<8x256xf32> -> vector<8x256xf32>
    %c0_29 = arith.constant 0 : index
    %c0_30 = arith.constant 0 : index
    %55 = vector.load %arg5[%c0_29, %c0_30] : memref<8x1xf32, #tpu.memory_space<vmem>>, vector<8x1xf32>
    %56 = vector.broadcast %55 : vector<8x1xf32> to vector<8x256xf32>
    %57 = arith.addf %54, %56 : vector<8x256xf32>
    %58 = arith.negf %57 : vector<8x256xf32>
    %59 = math.exp %58 : vector<8x256xf32>
    %cst_31 = arith.constant 1.000000e+00 : f32
    %60 = vector.broadcast %cst_31 : f32 to vector<8x256xf32>
    %61 = arith.addf %60, %59 : vector<8x256xf32>
    %62 = arith.divf %60, %61 : vector<8x256xf32>
    %63 = arith.mulf %57, %62 : vector<8x256xf32>
    %c0_32 = arith.constant 0 : index
    %c17_33 = arith.constant 17 : index
    %64 = vector.load %arg15[%c0_32, %c17_33] : memref<8x290xf32, #tpu.memory_space<vmem>>, vector<8x256xf32>
    tpu.vector_store %arg15[%c0_32, %c17_33], %63 {strides = array<i32>} : memref<8x290xf32, #tpu.memory_space<vmem>>, vector<8x256xf32>,
    %c0_34 = arith.constant 0 : index
    %c0_35 = arith.constant 0 : index
    %65 = vector.load %arg15[%c0_34, %c0_35] : memref<8x290xf32, #tpu.memory_space<vmem>>, vector<8x256xf32>
    %66 = vector.broadcast %9 : vector<1x256xf32> to vector<8x256xf32>
    %67 = arith.mulf %65, %66 : vector<8x256xf32>
    %c0_36 = arith.constant 0 : index
    %c1_37 = arith.constant 1 : index
    %68 = vector.load %arg15[%c0_36, %c1_37] : memref<8x290xf32, #tpu.memory_space<vmem>>, vector<8x256xf32>
    %c0_38 = arith.constant 0 : index
    %c2_39 = arith.constant 2 : index
    %69 = vector.load %arg15[%c0_38, %c2_39] : memref<8x290xf32, #tpu.memory_space<vmem>>, vector<8x256xf32>
    %70 = vector.broadcast %14 : vector<1x256xf32> to vector<8x256xf32>
    %71 = arith.mulf %69, %70 : vector<8x256xf32>
    %c0_40 = arith.constant 0 : index
    %c16_41 = arith.constant 16 : index
    %72 = vector.load %arg15[%c0_40, %c16_41] : memref<8x290xf32, #tpu.memory_space<vmem>>, vector<8x256xf32>
    %73 = vector.broadcast %9 : vector<1x256xf32> to vector<8x256xf32>
    %74 = arith.mulf %72, %73 : vector<8x256xf32>
    %c0_42 = arith.constant 0 : index
    %c17_43 = arith.constant 17 : index
    %75 = vector.load %arg15[%c0_42, %c17_43] : memref<8x290xf32, #tpu.memory_space<vmem>>, vector<8x256xf32>
    %c0_44 = arith.constant 0 : index
    %c18_45 = arith.constant 18 : index
    %76 = vector.load %arg15[%c0_44, %c18_45] : memref<8x290xf32, #tpu.memory_space<vmem>>, vector<8x256xf32>
    %77 = vector.broadcast %14 : vector<1x256xf32> to vector<8x256xf32>
    %78 = arith.mulf %76, %77 : vector<8x256xf32>
    %c0_46 = arith.constant 0 : index
    %c32_47 = arith.constant 32 : index
    %79 = vector.load %arg15[%c0_46, %c32_47] : memref<8x290xf32, #tpu.memory_space<vmem>>, vector<8x256xf32>
    %80 = vector.broadcast %9 : vector<1x256xf32> to vector<8x256xf32>
    %81 = arith.mulf %79, %80 : vector<8x256xf32>
    %c0_48 = arith.constant 0 : index
    %c33_49 = arith.constant 33 : index
    %82 = vector.load %arg15[%c0_48, %c33_49] : memref<8x290xf32, #tpu.memory_space<vmem>>, vector<8x256xf32>
    %c0_50 = arith.constant 0 : index
    %c34_51 = arith.constant 34 : index
    %83 = vector.load %arg15[%c0_50, %c34_51] : memref<8x290xf32, #tpu.memory_space<vmem>>, vector<8x256xf32>
    %84 = vector.broadcast %14 : vector<1x256xf32> to vector<8x256xf32>
    %85 = arith.mulf %83, %84 : vector<8x256xf32>
    %86 = tpu.concatenate %67, %68, %71, %74, %75, %78, %81, %82, %85 in 0 : vector<8x256xf32>, vector<8x256xf32>, vector<8x256xf32>, vector<8x256xf32>, vector<8x256xf32>, vector<8x256xf32>, vector<8x256xf32>, vector<8x256xf32>, vector<8x256xf32> -> vector<72x256xf32>
    %c0_52 = arith.constant 0 : index
    %c0_53 = arith.constant 0 : index
    %87 = vector.load %arg6[%c0_52, %c0_53] : memref<8x72xf32, #tpu.memory_space<vmem>>, vector<8x72xf32>
    %cst_54 = arith.constant dense<0.000000e+00> : vector<8x256xf32>
    %88 = tpu.matmul %87, %86, %cst_54 {dimension_numbers = #tpu.dot_dimension_numbers<[1], [0], [0], [1], [0, 0, 1, 1], [], []>} : vector<8x72xf32>, vector<72x256xf32>, vector<8x256xf32> -> vector<8x256xf32>
    %c0_55 = arith.constant 0 : index
    %c0_56 = arith.constant 0 : index
    %89 = vector.load %arg7[%c0_55, %c0_56] : memref<8x1xf32, #tpu.memory_space<vmem>>, vector<8x1xf32>
    %90 = vector.broadcast %89 : vector<8x1xf32> to vector<8x256xf32>
    %91 = arith.addf %88, %90 : vector<8x256xf32>
    %92 = arith.negf %91 : vector<8x256xf32>
    %93 = math.exp %92 : vector<8x256xf32>
    %cst_57 = arith.constant 1.000000e+00 : f32
    %94 = vector.broadcast %cst_57 : f32 to vector<8x256xf32>
    %95 = arith.addf %94, %93 : vector<8x256xf32>
    %96 = arith.divf %94, %95 : vector<8x256xf32>
    %97 = arith.mulf %91, %96 : vector<8x256xf32>
    %98 = arith.addf %29, %97 : vector<8x256xf32>
    %c0_58 = arith.constant 0 : index
    %c17_59 = arith.constant 17 : index
    %99 = vector.load %arg15[%c0_58, %c17_59] : memref<8x290xf32, #tpu.memory_space<vmem>>, vector<8x256xf32>
    tpu.vector_store %arg15[%c0_58, %c17_59], %98 {strides = array<i32>} : memref<8x290xf32, #tpu.memory_space<vmem>>, vector<8x256xf32>,
    %c0_60 = arith.constant 0 : index
    %c0_61 = arith.constant 0 : index
    %100 = vector.load %arg15[%c0_60, %c0_61] : memref<8x290xf32, #tpu.memory_space<vmem>>, vector<8x256xf32>
    %101 = vector.broadcast %9 : vector<1x256xf32> to vector<8x256xf32>
    %102 = arith.mulf %100, %101 : vector<8x256xf32>
    %c0_62 = arith.constant 0 : index
    %c1_63 = arith.constant 1 : index
    %103 = vector.load %arg15[%c0_62, %c1_63] : memref<8x290xf32, #tpu.memory_space<vmem>>, vector<8x256xf32>
    %c0_64 = arith.constant 0 : index
    %c2_65 = arith.constant 2 : index
    %104 = vector.load %arg15[%c0_64, %c2_65] : memref<8x290xf32, #tpu.memory_space<vmem>>, vector<8x256xf32>
    %105 = vector.broadcast %14 : vector<1x256xf32> to vector<8x256xf32>
    %106 = arith.mulf %104, %105 : vector<8x256xf32>
    %c0_66 = arith.constant 0 : index
    %c16_67 = arith.constant 16 : index
    %107 = vector.load %arg15[%c0_66, %c16_67] : memref<8x290xf32, #tpu.memory_space<vmem>>, vector<8x256xf32>
    %108 = vector.broadcast %9 : vector<1x256xf32> to vector<8x256xf32>
    %109 = arith.mulf %107, %108 : vector<8x256xf32>
    %c0_68 = arith.constant 0 : index
    %c17_69 = arith.constant 17 : index
    %110 = vector.load %arg15[%c0_68, %c17_69] : memref<8x290xf32, #tpu.memory_space<vmem>>, vector<8x256xf32>
    %c0_70 = arith.constant 0 : index
    %c18_71 = arith.constant 18 : index
    %111 = vector.load %arg15[%c0_70, %c18_71] : memref<8x290xf32, #tpu.memory_space<vmem>>, vector<8x256xf32>
    %112 = vector.broadcast %14 : vector<1x256xf32> to vector<8x256xf32>
    %113 = arith.mulf %111, %112 : vector<8x256xf32>
    %c0_72 = arith.constant 0 : index
    %c32_73 = arith.constant 32 : index
    %114 = vector.load %arg15[%c0_72, %c32_73] : memref<8x290xf32, #tpu.memory_space<vmem>>, vector<8x256xf32>
    %115 = vector.broadcast %9 : vector<1x256xf32> to vector<8x256xf32>
    %116 = arith.mulf %114, %115 : vector<8x256xf32>
    %c0_74 = arith.constant 0 : index
    %c33_75 = arith.constant 33 : index
    %117 = vector.load %arg15[%c0_74, %c33_75] : memref<8x290xf32, #tpu.memory_space<vmem>>, vector<8x256xf32>
    %c0_76 = arith.constant 0 : index
    %c34_77 = arith.constant 34 : index
    %118 = vector.load %arg15[%c0_76, %c34_77] : memref<8x290xf32, #tpu.memory_space<vmem>>, vector<8x256xf32>
    %119 = vector.broadcast %14 : vector<1x256xf32> to vector<8x256xf32>
    %120 = arith.mulf %118, %119 : vector<8x256xf32>
    %121 = tpu.concatenate %102, %103, %106, %109, %110, %113, %116, %117, %120 in 0 : vector<8x256xf32>, vector<8x256xf32>, vector<8x256xf32>, vector<8x256xf32>, vector<8x256xf32>, vector<8x256xf32>, vector<8x256xf32>, vector<8x256xf32>, vector<8x256xf32> -> vector<72x256xf32>
    %c0_78 = arith.constant 0 : index
    %c0_79 = arith.constant 0 : index
    %122 = vector.load %arg8[%c0_78, %c0_79] : memref<8x72xf32, #tpu.memory_space<vmem>>, vector<8x72xf32>
    %cst_80 = arith.constant dense<0.000000e+00> : vector<8x256xf32>
    %123 = tpu.matmul %122, %121, %cst_80 {dimension_numbers = #tpu.dot_dimension_numbers<[1], [0], [0], [1], [0, 0, 1, 1], [], []>} : vector<8x72xf32>, vector<72x256xf32>, vector<8x256xf32> -> vector<8x256xf32>
    %c0_81 = arith.constant 0 : index
    %c0_82 = arith.constant 0 : index
    %124 = vector.load %arg9[%c0_81, %c0_82] : memref<8x1xf32, #tpu.memory_space<vmem>>, vector<8x1xf32>
    %125 = vector.broadcast %124 : vector<8x1xf32> to vector<8x256xf32>
    %126 = arith.addf %123, %125 : vector<8x256xf32>
    %127 = arith.negf %126 : vector<8x256xf32>
    %128 = math.exp %127 : vector<8x256xf32>
    %cst_83 = arith.constant 1.000000e+00 : f32
    %129 = vector.broadcast %cst_83 : f32 to vector<8x256xf32>
    %130 = arith.addf %129, %128 : vector<8x256xf32>
    %131 = arith.divf %129, %130 : vector<8x256xf32>
    %132 = arith.mulf %126, %131 : vector<8x256xf32>
    %c0_84 = arith.constant 0 : index
    %c17_85 = arith.constant 17 : index
    %133 = vector.load %arg15[%c0_84, %c17_85] : memref<8x290xf32, #tpu.memory_space<vmem>>, vector<8x256xf32>
    tpu.vector_store %arg15[%c0_84, %c17_85], %132 {strides = array<i32>} : memref<8x290xf32, #tpu.memory_space<vmem>>, vector<8x256xf32>,
    %c0_86 = arith.constant 0 : index
    %c0_87 = arith.constant 0 : index
    %134 = vector.load %arg15[%c0_86, %c0_87] : memref<8x290xf32, #tpu.memory_space<vmem>>, vector<8x256xf32>
    %135 = vector.broadcast %9 : vector<1x256xf32> to vector<8x256xf32>
    %136 = arith.mulf %134, %135 : vector<8x256xf32>
    %c0_88 = arith.constant 0 : index
    %c1_89 = arith.constant 1 : index
    %137 = vector.load %arg15[%c0_88, %c1_89] : memref<8x290xf32, #tpu.memory_space<vmem>>, vector<8x256xf32>
    %c0_90 = arith.constant 0 : index
    %c2_91 = arith.constant 2 : index
    %138 = vector.load %arg15[%c0_90, %c2_91] : memref<8x290xf32, #tpu.memory_space<vmem>>, vector<8x256xf32>
    %139 = vector.broadcast %14 : vector<1x256xf32> to vector<8x256xf32>
    %140 = arith.mulf %138, %139 : vector<8x256xf32>
    %c0_92 = arith.constant 0 : index
    %c16_93 = arith.constant 16 : index
    %141 = vector.load %arg15[%c0_92, %c16_93] : memref<8x290xf32, #tpu.memory_space<vmem>>, vector<8x256xf32>
    %142 = vector.broadcast %9 : vector<1x256xf32> to vector<8x256xf32>
    %143 = arith.mulf %141, %142 : vector<8x256xf32>
    %c0_94 = arith.constant 0 : index
    %c17_95 = arith.constant 17 : index
    %144 = vector.load %arg15[%c0_94, %c17_95] : memref<8x290xf32, #tpu.memory_space<vmem>>, vector<8x256xf32>
    %c0_96 = arith.constant 0 : index
    %c18_97 = arith.constant 18 : index
    %145 = vector.load %arg15[%c0_96, %c18_97] : memref<8x290xf32, #tpu.memory_space<vmem>>, vector<8x256xf32>
    %146 = vector.broadcast %14 : vector<1x256xf32> to vector<8x256xf32>
    %147 = arith.mulf %145, %146 : vector<8x256xf32>
    %c0_98 = arith.constant 0 : index
    %c32_99 = arith.constant 32 : index
    %148 = vector.load %arg15[%c0_98, %c32_99] : memref<8x290xf32, #tpu.memory_space<vmem>>, vector<8x256xf32>
    %149 = vector.broadcast %9 : vector<1x256xf32> to vector<8x256xf32>
    %150 = arith.mulf %148, %149 : vector<8x256xf32>
    %c0_100 = arith.constant 0 : index
    %c33_101 = arith.constant 33 : index
    %151 = vector.load %arg15[%c0_100, %c33_101] : memref<8x290xf32, #tpu.memory_space<vmem>>, vector<8x256xf32>
    %c0_102 = arith.constant 0 : index
    %c34_103 = arith.constant 34 : index
    %152 = vector.load %arg15[%c0_102, %c34_103] : memref<8x290xf32, #tpu.memory_space<vmem>>, vector<8x256xf32>
    %153 = vector.broadcast %14 : vector<1x256xf32> to vector<8x256xf32>
    %154 = arith.mulf %152, %153 : vector<8x256xf32>
    %155 = tpu.concatenate %136, %137, %140, %143, %144, %147, %150, %151, %154 in 0 : vector<8x256xf32>, vector<8x256xf32>, vector<8x256xf32>, vector<8x256xf32>, vector<8x256xf32>, vector<8x256xf32>, vector<8x256xf32>, vector<8x256xf32>, vector<8x256xf32> -> vector<72x256xf32>
    %c0_104 = arith.constant 0 : index
    %c0_105 = arith.constant 0 : index
    %156 = vector.load %arg10[%c0_104, %c0_105] : memref<8x72xf32, #tpu.memory_space<vmem>>, vector<8x72xf32>
    %cst_106 = arith.constant dense<0.000000e+00> : vector<8x256xf32>
    %157 = tpu.matmul %156, %155, %cst_106 {dimension_numbers = #tpu.dot_dimension_numbers<[1], [0], [0], [1], [0, 0, 1, 1], [], []>} : vector<8x72xf32>, vector<72x256xf32>, vector<8x256xf32> -> vector<8x256xf32>
    %c0_107 = arith.constant 0 : index
    %c0_108 = arith.constant 0 : index
    %158 = vector.load %arg11[%c0_107, %c0_108] : memref<8x1xf32, #tpu.memory_space<vmem>>, vector<8x1xf32>
    %159 = vector.broadcast %158 : vector<8x1xf32> to vector<8x256xf32>
    %160 = arith.addf %157, %159 : vector<8x256xf32>
    %161 = arith.negf %160 : vector<8x256xf32>
    %162 = math.exp %161 : vector<8x256xf32>
    %cst_109 = arith.constant 1.000000e+00 : f32
    %163 = vector.broadcast %cst_109 : f32 to vector<8x256xf32>
    %164 = arith.addf %163, %162 : vector<8x256xf32>
    %165 = arith.divf %163, %164 : vector<8x256xf32>
    %166 = arith.mulf %160, %165 : vector<8x256xf32>
    %167 = arith.addf %98, %166 : vector<8x256xf32>
    %168 = tpu.concatenate %28, %98, %167 in 0 : vector<8x256xf32>, vector<8x256xf32>, vector<8x256xf32> -> vector<24x256xf32>
    %c0_110 = arith.constant 0 : index
    %c0_111 = arith.constant 0 : index
    %169 = vector.load %arg12[%c0_110, %c0_111] : memref<16x24xf32, #tpu.memory_space<vmem>>, vector<16x24xf32>
    %cst_112 = arith.constant dense<0.000000e+00> : vector<16x256xf32>
    %170 = tpu.matmul %169, %168, %cst_112 {dimension_numbers = #tpu.dot_dimension_numbers<[1], [0], [0], [1], [0, 0, 1, 1], [], []>} : vector<16x24xf32>, vector<24x256xf32>, vector<16x256xf32> -> vector<16x256xf32>
    %c0_113 = arith.constant 0 : index
    %c0_114 = arith.constant 0 : index
    %171 = vector.load %arg13[%c0_113, %c0_114] : memref<16x1xf32, #tpu.memory_space<vmem>>, vector<16x1xf32>
    %172 = vector.broadcast %171 : vector<16x1xf32> to vector<16x256xf32>
    %173 = arith.addf %170, %172 : vector<16x256xf32>
    %174 = arith.negf %173 : vector<16x256xf32>
    %175 = math.exp %174 : vector<16x256xf32>
    %cst_115 = arith.constant 1.000000e+00 : f32
    %176 = vector.broadcast %cst_115 : f32 to vector<16x256xf32>
    %177 = arith.addf %176, %175 : vector<16x256xf32>
    %178 = arith.divf %176, %177 : vector<16x256xf32>
    %179 = arith.mulf %173, %178 : vector<16x256xf32>
    %180 = vector.shape_cast %179 : vector<16x256xf32> to vector<1x16x256xf32>
    %c0_116 = arith.constant 0 : index
    %c0_117 = arith.constant 0 : index
    %c0_118 = arith.constant 0 : index
    %181 = vector.load %arg14[%c0_116, %c0_117, %c0_118] : memref<1x16x256xf32, #tpu.memory_space<vmem>>, vector<1x16x256xf32>
    tpu.vector_store %arg14[%c0_116, %c0_117, %c0_118], %180 {strides = array<i32>} : memref<1x16x256xf32, #tpu.memory_space<vmem>>, vector<1x16x256xf32>,
    return
  }
  func.func @transform_0(%arg0: i32) -> (i32, i32, i32) {
    %c0_i32 = arith.constant 0 : i32
    %c0_i32_0 = arith.constant 0 : i32
    %c0_i32_1 = arith.constant 0 : i32
    return %arg0, %c0_i32, %c0_i32_0 : i32, i32, i32
  }
  func.func @transform_1(%arg0: i32) -> (i32, i32) {
    %c0_i32 = arith.constant 0 : i32
    %c0_i32_0 = arith.constant 0 : i32
    %c0_i32_1 = arith.constant 0 : i32
    return %c0_i32, %c0_i32_0 : i32, i32
  }
  func.func @transform_2(%arg0: i32) -> (i32, i32) {
    %c0_i32 = arith.constant 0 : i32
    %c0_i32_0 = arith.constant 0 : i32
    %c0_i32_1 = arith.constant 0 : i32
    return %c0_i32, %c0_i32_0 : i32, i32
  }
  func.func @transform_3(%arg0: i32) -> (i32, i32) {
    %c0_i32 = arith.constant 0 : i32
    %c0_i32_0 = arith.constant 0 : i32
    %c0_i32_1 = arith.constant 0 : i32
    return %c0_i32, %c0_i32_0 : i32, i32
  }
  func.func @transform_4(%arg0: i32) -> (i32, i32) {
    %c0_i32 = arith.constant 0 : i32
    %c0_i32_0 = arith.constant 0 : i32
    %c0_i32_1 = arith.constant 0 : i32
    return %c0_i32, %c0_i32_0 : i32, i32
  }
  func.func @transform_5(%arg0: i32) -> (i32, i32) {
    %c0_i32 = arith.constant 0 : i32
    %c0_i32_0 = arith.constant 0 : i32
    %c0_i32_1 = arith.constant 0 : i32
    return %c0_i32, %c0_i32_0 : i32, i32
  }
  func.func @transform_6(%arg0: i32) -> (i32, i32) {
    %c0_i32 = arith.constant 0 : i32
    %c0_i32_0 = arith.constant 0 : i32
    %c0_i32_1 = arith.constant 0 : i32
    return %c0_i32, %c0_i32_0 : i32, i32
  }
  func.func @transform_7(%arg0: i32) -> (i32, i32) {
    %c0_i32 = arith.constant 0 : i32
    %c0_i32_0 = arith.constant 0 : i32
    %c0_i32_1 = arith.constant 0 : i32
    return %c0_i32, %c0_i32_0 : i32, i32
  }
  func.func @transform_8(%arg0: i32) -> (i32, i32) {
    %c0_i32 = arith.constant 0 : i32
    %c0_i32_0 = arith.constant 0 : i32
    %c0_i32_1 = arith.constant 0 : i32
    return %c0_i32, %c0_i32_0 : i32, i32
  }
  func.func @transform_9(%arg0: i32) -> (i32, i32) {
    %c0_i32 = arith.constant 0 : i32
    %c0_i32_0 = arith.constant 0 : i32
    %c0_i32_1 = arith.constant 0 : i32
    return %c0_i32, %c0_i32_0 : i32, i32
  }
  func.func @transform_10(%arg0: i32) -> (i32, i32) {
    %c0_i32 = arith.constant 0 : i32
    %c0_i32_0 = arith.constant 0 : i32
    %c0_i32_1 = arith.constant 0 : i32
    return %c0_i32, %c0_i32_0 : i32, i32
  }
  func.func @transform_11(%arg0: i32) -> (i32, i32) {
    %c0_i32 = arith.constant 0 : i32
    %c0_i32_0 = arith.constant 0 : i32
    %c0_i32_1 = arith.constant 0 : i32
    return %c0_i32, %c0_i32_0 : i32, i32
  }
  func.func @transform_12(%arg0: i32) -> (i32, i32) {
    %c0_i32 = arith.constant 0 : i32
    %c0_i32_0 = arith.constant 0 : i32
    %c0_i32_1 = arith.constant 0 : i32
    return %c0_i32, %c0_i32_0 : i32, i32
  }
  func.func @transform_13(%arg0: i32) -> (i32, i32, i32) {
    %c0_i32 = arith.constant 0 : i32
    %c0_i32_0 = arith.constant 0 : i32
    %c0_i32_1 = arith.constant 0 : i32
    return %arg0, %c0_i32, %c0_i32_0 : i32, i32, i32
  }
}

</mosaic_0001>

<bundles_post_ra>
// kernel: tpu_custom_call.1
= control target key start
LH: loop header
LB: loop body
LE: loop exit
PB: predicated region body
PF: predicated region fallthrough
CT: control target
= control target key end

     0   :  { %s3017_s0 = inlined_call_operand.hbm [shape: f32[2,16,256], index: 0, kind: input, shape index: {}]   ;;  %s3018_s1 = inlined_call_operand.vmem [shape: f32[16,16], index: 1, kind: input, shape index: {}]   ;;  %s3019_s2 = inlined_call_operand.vmem [shape: f32[16,1], index: 2, kind: input, shape index: {}]   ;;  %s3020_s3 = inlined_call_operand.vmem [shape: f32[8,72], index: 3, kind: input, shape index: {}]   ;;  %s3021_s4 = inlined_call_operand.vmem [shape: f32[8,1], index: 4, kind: input, shape index: {}]   ;;  %s3022_s5 = inlined_call_operand.vmem [shape: f32[8,72], index: 5, kind: input, shape index: {}]   ;;  %s3023_s6 = inlined_call_operand.vmem [shape: f32[8,1], index: 6, kind: input, shape index: {}]   ;;  %s3024_s7 = inlined_call_operand.vmem [shape: f32[8,72], index: 7, kind: input, shape index: {}]   ;;  %s3025_s8 = inlined_call_operand.vmem [shape: f32[8,1], index: 8, kind: input, shape index: {}]   ;;  %s3026_s9 = inlined_call_operand.vmem [shape: f32[8,72], index: 9, kind: input, shape index: {}]   ;;  %s3027_s10 = inlined_call_operand.vmem [shape: f32[8,1], index: 10, kind: input, shape index: {}]   ;;  %s3028_s11 = inlined_call_operand.vmem [shape: f32[16,24], index: 11, kind: input, shape index: {}]   ;;  %s3029_s12 = inlined_call_operand.vmem [shape: f32[16,1], index: 12, kind: input, shape index: {}]   ;;  %s3030_s13 = inlined_call_operand.hbm [shape: f32[2,16,256], index: 13, kind: output, shape index: {}]  }
   0x1   :  { %3042 = sst [smem:[#allocation15_spill]] %s3017_s0 }
   0x2   :  { %3043 = sst [smem:[#allocation16_spill]] %s3030_s13 }
   0x3   :  { %18 = vsyncpa [#allocation4], 0 }
   0x4   :  { %20 = vsyncpa [#allocation4 + $0x1], 0 }
   0x5   :  { %21 = vsyncpa [#allocation5], 0 }
   0x6   :  { %23 = vsyncpa [#allocation5 + $0x1], 0  ;;  %s2373_s25 = smov 0   ;;  %s2375_s26 = smov 0  }
   0x7   :  { %s2377_s27 = smov 0   ;;  %s2379_s28 = smov 0  }
   0x8 LB: > { %3044 = sst [smem:[#allocation9_spill]] %s2270_s25  ;;  %s2394_s29 = sadd.s32 4294967295, %s2282_s28   ;;  %s2282_s28 = sphi %s2379_s28, %s3081_s28   ;;  %s2278_s27 = sphi %s2377_s27, %s3083_s27   ;;  %s2274_s26 = sphi %s2375_s26, %s3085_s26   ;;  %s2270_s25 = sphi %s2373_s25, %s3084_s25  }
   0x9   : > { %3045 = sst [smem:[#allocation10_spill]] %s2278_s27  ;;  %s1815_s30 = sadd.s32 4294967294, %s2282_s28  }
   0xa   : > { %s2398_s14 = sadd.s32 1, %s2282_s28   ;;  %s36_s15 = sadd.s32 1, %s2278_s27 }
   0xb   : > { %3046 = sst [smem:[#allocation11_spill]] %s2398_s14  ;;  %s33_s16 = ssub.s32 %s2282_s28, %s2398_s14 }
   0xc   : > { %p43_p0 = scmp.ne.s32.totalorder %s2278_s27, %s2274_s26  ;;  %p34_p1 = scmp.eq.s32.totalorder %s33_s16, 0 }
   0xd   : > { %p44_p2 = scmp.eq.s32.totalorder %s2282_s28, 0  ;;  %p49_p3 = scmp.ne.s32.totalorder %s2274_s26, %s2270_s25 }
   0xe   : > { %p50_p4 = scmp.eq.s32.totalorder %s2394_s29, 0  ;;  %p325_p7 = scmp.eq.s32.totalorder %s2394_s29, 1 }
   0xf   : > { %s2410_s17 = scalar_select %p34_p1, %s2278_s27, %s36_s15  }
  0x10   : > { %p2412_p5 = por %p44_p2, %p43_p0  ;;  %p2416_p6 = por %p50_p4, %p49_p3 }
  0x11   : > { %3047 = sst [smem:[#allocation12_spill]] %s2410_s17  ;;  %p331_p8 = scmp.eq.s32.totalorder %s1815_s30, 1 }
  0x12   : > { %p1881_p10 = scmp.lt.s32.totalorder %s2282_s28, 2  ;;  %p2423_p11 = por %p325_p7, %p43_p0 }
  0x13   : > { %p2427_p12 = por %p331_p8, %p49_p3  ;;  %s387_s22 = sand.u32 1, %s2278_s27  }
  0x14   : > { %s3050_s20 = scalar_select %p2423_p11, 1, 0 }
  0x15   : > { %s3052_s21 = scalar_select %p2427_p12, 1, 0 }
  0x16   : > { %3051 = sst [smem:[#allocation13_spill]] %s3050_s20  ;;  %s1861_s23 = sshll.u32 %s2282_s28, 5 }
  0x17   : > { %3053 = sst [smem:[#allocation14_spill]] %s3052_s21  ;;  %s1818_s24 = sshll.u32 %s387_s22, 5 }
  0x18   : > { %s3054_s0 = sld [smem:[#allocation15_spill]]  ;;  %s391_s30 = scalar_lea.vmem [#allocation3], %s1818_s24 }
  0x19   : > { %s399_s25 = sshll.u32 %s391_s30, 4  ;;  %p2438_p13 = pnand %p1881_p10, %p2412_p5  ;;  %s400_s25 = int_to_ptr.vmem [resolvable:$true] %s399_s25 }
  0x1a   : > { %p1821_p0 = scmp.ge.s32.totalorder %s2282_s28, 1  ;;  %p407_p1 = scmp.lt.s32.totalorder %s2282_s28, 3 }
  0x1b   : > { %s388_s27 = scalar_lea.sflag [#allocation4], %s387_s22  ;;  %p2190_p3 = pneg %p2438_p13 }
  0x1e   : > { %s396_s17 = scalar_lea.hbm %s3054_s0, %s1861_s23  ;;  %s2193_s18 = scalar_lea.hbm %s3054_s0, 64 }
  0x1f   : > { %s397_s14 = sshll.u32 %s396_s17, 4  ;;  %s398_s14 = int_to_ptr.hbm [resolvable:$true] %s397_s14 }
  0x20   : > { %s2186_s21 = sshra.s32 %s398_s14, 4  ;;  %s2187_s21 = int_to_ptr.hbm [resolvable:$true] %s2186_s21 }
  0x21   : > { %s2188_s20 = scalar_lea.hbm %s2187_s21, 32  ;;  %p2194_p5 = scmp.lt.s32.totalorder %s2187_s21, %s3054_s0 }
  0x22   : > { %p2189_p2 = scmp.ne.s32.totalorder %s2187_s21, %s2188_s20  ;;  %p2195_p8 = scmp.lt.s32.totalorder %s2193_s18, %s2188_s20 }
  0x24   : > { %p2191_p4 = pnand %p2190_p3, %p2189_p2  ;;  %p2196_p10 = por %p2195_p8, %p2194_p5 }
  0x26   : > { %p2192_p7 = pneg %p2191_p4 }
  0x28   : > { %p2197_p9 = pnand %p2196_p10, %p2192_p7 }
  0x2a   : > { %2200 = shalt.err (!%p2197_p9)
}
  0x2b   : > { %s2284_s22 = smov 256   ;;  %s2285_s16 = smov 16  }
  0x2c   : > { %1876 = dma.hbm_to_vmem [thread:$0]  (!%p2438_p13), %s398_s14, 512, %s400_s25, %s388_s27, %s2284_s22, %s2284_s22, %s2285_s16  }
  0x2d   : > { %p408_p2 = pnand %p1821_p0, %p407_p1 }
  0x2e   : > { %s2459_s30 = sand.u32 (!%p408_p2), 1, %s2274_s26  }
  0x2f   : > { %411 = sbr.rel (%p408_p2) target bundleno = 2153 (0x869), region = 72  ;;  %s1822_s20 = sshll.u32 (!%p408_p2), %s2459_s30, 5 }
  0x30   : > { %s414_s21 = scalar_lea.sflag (!%p408_p2), [#allocation4], %s2459_s30  ;;  %s417_s17 = scalar_lea.vmem (!%p408_p2), [#allocation3], %s1822_s20 }
  0x34   : > { %2261 = dma.done.wait (%p2416_p6), %s414_s21, 512  }
  0x35   : > { %2263 = vsyncadd (%p2416_p6), %s414_s21, 4294966784  ;;  %v2286_v0 = vmov 0   ;;  %v480_v1 = vld [vmem:[%s417_s17 + $0x10] sm:$0xff]  ;;  %v481_v2 = vld [vmem:[%s417_s17 + $0x18] sm:$0xff]  ;;  %vm496_vm0 = vcmask 130048   ;;  %v465_v11 = vlaneseq  ;;  %v2287_v19 = vmov 0.0  }
  0x36   : > { %1934 = vset.pattern.permute.xlu0 %v2286_v0  ;;  %2040 = vset.pattern.permute.xlu1 %v2286_v0  ;;  %v478_v3 = vld [vmem:[%s417_s17] sm:$0xff]  ;;  %v479_v4 = vld [vmem:[%s417_s17 + $0x8] sm:$0xff]  ;;  %v485_v6 = vld [vmem:[%s3019_s2 + $0x8] sm:$0xff]  ;;  %461 = vst [vmem:[#allocation2] sm:$0xff] %v2287_v19  ;;  %s2288_s18 = smov 32   ;;  %s2289_s24 = smov 18  }
  0x37   : > { %2081 = vset.pattern.permute.xlu2 %v2286_v0  ;;  %517 = vmatpush.msra.mxu0 %v480_v1  ;;  %v482_v5 = vld [vmem:[%s3018_s1] sm:$0xff]  ;;  %v483_v7 = vld [vmem:[%s3018_s1 + $0x8] sm:$0xff]  ;;  %v466_v14 = vand.u32 127, %v465_v11  ;;  %s2290_s15 = smov 17   ;;  %s2291_s22 = smov 16   ;;  %vm463_vm13 = vcmask 277504  }
  0x38   : > { %540 = vmatpush.msra.mxu1 %v481_v2  ;;  %493 = vperm.xlu0 %1934, %v485_v6   ;;  %s2292_s16 = smov 34   ;;  %s2293_s21 = smov 2   ;;  %464 = vst.msk [vmem:[#allocation2 + $0x10] sm:$0xff] %vm463_vm13, %v2287_v19  ;;  %vm640_vm14 = vcmask 1047688   ;;  %vm635_vm15 = vcmask 138240  }
  0x39   : > { %518 = vmatpush.msra.mxu0 %v478_v3  ;;  %v467_v20 = vadd.s32 128, %v466_v14  ;;  %v468_v21 = vand.u32 15, %v466_v14  ;;  %s2294_s17 = smov 95   ;;  %s2295_s13 = smov 94  }
  0x3a   : > { %541 = vmatpush.msra.mxu1 %v479_v4  ;;  %1824 = vmatmul.msk.f32.vlgmr.msra.gmra.mxu0 %vm496_vm0, %v482_v5  ;;  %s2296_s25 = smov 111   ;;  %s2297_s27 = smov 110  }
  0x3b   : > { %1826 = vmatmul.msk.f32.vlgmr.msra.gmra.mxu1 %vm496_vm0, %v482_v5  ;;  %v469_v22 = vand.u32 15, %v467_v20  ;;  %vm470_vm1 = vcmp.ge.s32.totalorder %v468_v21, 1  ;;  %vm474_vm3 = vcmp.le.s32.totalorder %v468_v21, 14  ;;  %s2298_s14 = smov 96   ;;  %s2299_s19 = smov 112  }
  0x3c   : > { %v2488_v27 = vsel %vm470_vm1, 1.0, %v2287_v19  ;;  %v476_v33 = vsel %vm474_vm3, 1.0, %v2287_v19  ;;  %vm692_vm1 = vcmask 261120   ;;  %vm655_vm3 = vcmask 15360   ;;  %s2300_s23 = smov 126  }
  0x3d   : > { %vm471_vm2 = vcmp.ge.s32.totalorder %v469_v22, 1  ;;  %vm475_vm4 = vcmp.le.s32.totalorder %v469_v22, 14 }
  0x3e   : > { %v2491_v28 = vsel %vm471_vm2, 1.0, %v2287_v19  ;;  %v477_v34 = vsel %vm475_vm4, 1.0, %v2287_v19  ;;  %vm680_vm2 = vcmask 146432   ;;  %vm798_vm4 = vcmask 777216  }
  0x3f   : > { %v1940_v29 = vpack.i.bf16 %v2491_v28, %v2488_v27  ;;  %v1945_v36 = vpack.i.bf16 %v477_v34, %v476_v33 }
  0x41   : > { %1941 = vrot.lane.b32.xlu2 %v1940_v29, %s2288_s18  ;;  %s2301_s18 = smov 127  }
  0x42   : > { %1825 = vmatmul.msk.f32.gmra.mxu0 %vm496_vm0, %v483_v7 }
  0x43   : > { %1827 = vmatmul.msk.f32.gmra.mxu1 %vm496_vm0, %v483_v7 }
  0x49   : > { %1946 = vrot.lane.b32.xlu2 %v1945_v36, %s2289_s24 }
  0x9b   : > { %v1942_v57 = vpop.permute.xlu2 %1941 }
  0x9c   : > { %v2538_v5 = vunpack.i.h.bf16 %v1942_v57  ;;  %v2540_v6 = vunpack.i.l.bf16 %v1942_v57 }
  0x9e   : > { %v2554_v14 = vsel %vm692_vm1, %v2540_v6, %v2538_v5 }
  0xa3   : > { %v1947_v2 = vpop.permute.xlu2 %1946 }
  0xa4   : > { %v2534_v4 = vunpack.i.h.bf16 %v1947_v2 }
  0xaa   : > { %v494_v10 = vpop.permute.xlu0 %493 }
  0xb7   : > { %v2482_v8 = vpop.f32.mrf.mxu0 }
  0xb8   : > { %v2484_v9 = vpop.f32.mrf.mxu1 }
  0xbf   : > { %v523_v12 = vpop.f32.mrf.mxu0 }
  0xc0   : > { %v546_v13 = vpop.f32.mrf.mxu1  ;;  %v524_v15 = vadd.f32 %v523_v12, %v494_v10 }
  0xc1   : > { %v547_v16 = vadd.f32 %v546_v13, %v494_v10  ;;  %v2550_v13 = vunpack.i.l.bf16 %v1947_v2 }
  0xc2   : > { %v1830_v17 = vmul.f32 -1.442695, %v524_v15 }
  0xc3   : > { %v1831_v18 = vmul.f32 -1.442695, %v547_v16  ;;  %v2570_v22 = vsel %vm680_vm2, %v2550_v13, %v2534_v4 }
  0xc4   : > { %2122 = vpow2.f32 %v1830_v17 }
  0xc5   : > { %2124 = vpow2.f32 %v1831_v18 }
  0xca   : > { %v2123_v23 = vpop.eup %2122 }
  0xcb   : > { %v2125_v24 = vpop.eup %2124  ;;  %v563_v25 = vadd.f32 1.0, %v2123_v23 }
  0xcc   : > { %v564_v26 = vadd.f32 1.0, %v2125_v24 }
  0xcd   : > { %2126 = vrcp.f32 %v563_v25  ;;  %v606_v38 = vand.u32 2147483648, %v563_v25  ;;  %v604_v41 = vand.u32 2147483647, %v563_v25  ;;  %vm600_vm7 = vweird.f32 %v563_v25 }
  0xce   : > { %2128 = vrcp.f32 %v564_v26  ;;  %v621_v42 = vand.u32 2147483648, %v564_v26  ;;  %v619_v44 = vand.u32 2147483647, %v564_v26  ;;  %vm615_vm9 = vweird.f32 %v564_v26 }
  0xcf   : > { %v607_v46 = vor.u32 1.1754944e-38, %v606_v38  ;;  %vm605_vm10 = vcmp.eq.f32.partialorder %v604_v41, 8.507059e+37  ;;  %v818_v41 = vld [vmem:[%s3021_s4] sm:$0xff] }
  0xd0   : > { %v622_v49 = vor.u32 1.1754944e-38, %v621_v42  ;;  %vm620_vm12 = vcmp.eq.f32.partialorder %v619_v44, 8.507059e+37 }
  0xd3   : > { %v2127_v30 = vpop.eup %2126 }
  0xd4   : > { %v2129_v31 = vpop.eup %2128  ;;  %v596_v32 = vmul.f32 %v2127_v30, %v563_v25  ;;  %vm601_vm5 = vweird.f32 %v2127_v30 }
  0xd5   : > { %v611_v35 = vmul.f32 %v2129_v31, %v564_v26  ;;  %vm616_vm6 = vweird.f32 %v2129_v31  ;;  %vm602_vm8 = vmor %vm600_vm7, %vm601_vm5  ;;  %vm787_vm5 = vcmask 785408   ;;  %vm759_vm7 = vcmask 908288  }
  0xd6   : > { %v597_v37 = vsub.f32 1.0, %v596_v32  ;;  %vm617_vm11 = vmor %vm615_vm9, %vm616_vm6  ;;  %vm773_vm6 = vcmask 900096   ;;  %vm3041_vm9 = vcmask 1031168  }
  0xd7   : > { %v612_v39 = vsub.f32 1.0, %v611_v35 }
  0xd8   : > { %v598_v40 = vmul.f32 %v2127_v30, %v597_v37 }
  0xd9   : > { %v613_v43 = vmul.f32 %v2129_v31, %v612_v39 }
  0xda   : > { %v599_v45 = vadd.f32 %v2127_v30, %v598_v40 }
  0xdb   : > { %v614_v47 = vadd.f32 %v2129_v31, %v613_v43 }
  0xdc   : > { %v603_v48 = vsel %vm602_vm8, %v2127_v30, %v599_v45  ;;  %vm748_vm8 = vcmask 916480  }
  0xdd   : > { %v608_v50 = vsel %vm605_vm10, %v607_v46, %v603_v48  ;;  %v618_v51 = vsel %vm617_vm11, %v2129_v31, %v614_v47  ;;  %vm3040_vm10 = vcmask 1039360   ;;  %vm3039_vm11 = vcmask 588800  }
  0xde   : > { %v2497_v52 = vmul.f32 %v608_v50, %v524_v15  ;;  %v623_v53 = vsel %vm620_vm12, %v622_v49, %v618_v51 }
  0xdf   : > { %v2499_v54 = vmul.f32 %v623_v53, %v547_v16 }
  0xe0   : > { %631 = vrot.lane.b32.xlu0 %v2497_v52, %s2290_s15 }
  0xe1   : > { %633 = vrot.lane.b32.xlu1 %v2499_v54, %s2290_s15 }
  0xe8   : > { %1951 = vrot.lane.b32.xlu0 %v1940_v29, %s2291_s22 }
  0xe9   : > { %1936 = vrot.lane.b32.xlu1 %v1945_v36, %s2292_s16 }
  0xf1   : > { %1956 = vrot.lane.b32.xlu1 %v1945_v36, %s2293_s21 }
 0x152   : > { %v632_v55 = vpop.permute.xlu0 %631 }
 0x153   : > { %v634_v56 = vpop.permute.xlu1 %633  ;;  %641 = vst.msk [vmem:[#allocation2] sm:$0xff] %vm640_vm14, %v632_v55 }
 0x154   : > { %643 = vst.msk [vmem:[#allocation2 + $0x10] sm:$0xff] %vm635_vm15, %v634_v56  ;;  %v2511_v58 = vsel %vm635_vm15, %v632_v55, %v634_v56 }
 0x155   : > { %v698_v21 = vmul.f32 %v2554_v14, %v2511_v58  ;;  %v686_v30 = vmul.f32 %v2570_v22, %v2511_v58 }
 0x15a   : > { %v2513_v59 = vld [vmem:[#allocation2] sm:$0xff]  ;;  %v1952_v12 = vpop.permute.xlu0 %1951 }
 0x15b   : > { %v1937_v60 = vpop.permute.xlu1 %1936  ;;  %v2515_v61 = vld [vmem:[#allocation2 + $0x10] sm:$0xff]  ;;  %v1960_v62 = vpack.i.bf16 %v2511_v58, %v2513_v59  ;;  %v697_v16 = vmul.f32 %v2540_v6, %v2513_v59  ;;  %v2558_v17 = vunpack.i.h.bf16 %v1952_v12  ;;  %v2560_v18 = vunpack.i.l.bf16 %v1952_v12 }
 0x15c   : > { %v2519_v63 = vunpack.i.h.bf16 %v1937_v60  ;;  %796 = vrot.lane.b32.xlu2 %v2515_v61, %s2294_s17  ;;  %v2526_v1 = vunpack.i.l.bf16 %v1937_v60  ;;  %v687_v7 = vmul.f32 %v2534_v4, %v2515_v61  ;;  %v699_v19 = vmul.f32 %v2538_v5, %v2515_v61 }
 0x15d   : > { %1961 = vrot.lane.b32.xlu1 %v1960_v62, %s2294_s17  ;;  %v1975_v23 = vpack.i.bf16 %v698_v21, %v697_v16  ;;  %v685_v24 = vmul.f32 %v2550_v13, %v2513_v59  ;;  %v2581_v29 = vsel %vm496_vm0, %v2560_v18, %v2558_v17  ;;  %v673_v32 = vmul.f32 %v2560_v18, %v2513_v59 }
 0x15e   : > { %v710_v0 = vmul.f32 %v2519_v63, %v2515_v61  ;;  %v2532_v3 = vsel %vm463_vm13, %v2526_v1, %v2519_v63  ;;  %v708_v10 = vmul.f32 %v2526_v1, %v2513_v59  ;;  %v674_v33 = vmul.f32 %v2581_v29, %v2511_v58 }
 0x15f   : > { %v709_v11 = vmul.f32 %v2532_v3, %v2511_v58  ;;  %v1980_v31 = vpack.i.bf16 %v686_v30, %v685_v24  ;;  %v675_v34 = vmul.f32 %v2558_v17, %v2515_v61  ;;  %vm812_vm0 = vcmask 769024  }
 0x160   : > { %810 = vrot.lane.b32.xlu0 %v710_v0, %s2295_s13  ;;  %v1985_v36 = vpack.i.bf16 %v674_v33, %v673_v32 }
 0x161   : > { %v1970_v15 = vpack.i.bf16 %v709_v11, %v708_v10 }
 0x163   : > { %v1957_v20 = vpop.permute.xlu1 %1956 }
 0x164   : > { %757 = vrot.lane.b32.xlu2 %v2515_v61, %s2296_s25  ;;  %v2574_v25 = vunpack.i.h.bf16 %v1957_v20  ;;  %v2576_v26 = vunpack.i.l.bf16 %v1957_v20 }
 0x165   : > { %1966 = vrot.lane.b32.xlu1 %v1960_v62, %s2296_s25 }
 0x166   : > { %v2594_v35 = vsel %vm655_vm3, %v2576_v26, %v2574_v25  ;;  %v660_v37 = vmul.f32 %v2576_v26, %v2513_v59  ;;  %v662_v40 = vmul.f32 %v2574_v25, %v2515_v61 }
 0x167   : > { %v661_v38 = vmul.f32 %v2594_v35, %v2511_v58 }
 0x168   : > { %771 = vrot.lane.b32.xlu0 %v687_v7, %s2297_s27 }
 0x169   : > { %v1995_v39 = vpack.i.bf16 %v661_v38, %v660_v37 }
 0x16c   : > { %1971 = vrot.lane.b32.xlu2 %v1970_v15, %s2295_s13 }
 0x16d   : > { %785 = vrot.lane.b32.xlu1 %v699_v19, %s2298_s14 }
 0x170   : > { %1976 = vrot.lane.b32.xlu0 %v1975_v23, %s2298_s14 }
 0x174   : > { %1981 = vrot.lane.b32.xlu2 %v1980_v31, %s2297_s27 }
 0x175   : > { %746 = vrot.lane.b32.xlu1 %v675_v34, %s2299_s19 }
 0x178   : > { %1986 = vrot.lane.b32.xlu0 %v1985_v36, %s2299_s19 }
 0x17c   : > { %1996 = vrot.lane.b32.xlu2 %v1995_v39, %s2300_s23 }
 0x17d   : > { %1991 = vrot.lane.b32.xlu1 %v1960_v62, %s2301_s18 }
 0x180   : > { %732 = vrot.lane.b32.xlu0 %v662_v40, %s2300_s23 }
 0x184   : > { %718 = vrot.lane.b32.xlu2 %v2515_v61, %s2301_s18 }
 0x188   : > { %821 = vperm.xlu0 %1934, %v818_v41  }
 0x1b6   : > { %v797_v42 = vpop.permute.xlu2 %796 }
 0x1be   : > { %v758_v43 = vpop.permute.xlu2 %757 }
 0x1c6   : > { %v1972_v44 = vpop.permute.xlu2 %1971 }
 0x1c7   : > { %v1974_v45 = vunpack.i.h.bf16 %v1972_v44  ;;  %v1973_v46 = vunpack.i.l.bf16 %v1972_v44 }
 0x1c9   : > { %v813_v47 = vsel %vm812_vm0, %v1973_v46, %v1974_v45 }
 0x1ca   : > { %835 = vmatpush.msra.mxu2 %v813_v47  ;;  %v646_v47 = vmul.f32 %v2513_v59, %v2488_v27 }
 0x1ce   : > { %v1982_v61 = vpop.permute.xlu2 %1981 }
 0x1cf   : > { %v1962_v48 = vpop.permute.xlu1 %1961  ;;  %v1984_v2 = vunpack.i.h.bf16 %v1982_v61  ;;  %v1983_v7 = vunpack.i.l.bf16 %v1982_v61 }
 0x1d0   : > { %v1964_v49 = vunpack.i.h.bf16 %v1962_v48  ;;  %v1963_v50 = vunpack.i.l.bf16 %v1962_v48  ;;  %v817_v48 = vld [vmem:[%s3020_s3] sm:$0xff] }
 0x1d1   : > { %v774_v20 = vsel %vm773_vm6, %v1983_v7, %v1984_v2 }
 0x1d2   : > { %v811_v51 = vpop.permute.xlu0 %810  ;;  %v799_v53 = vsel %vm798_vm4, %v1963_v50, %v1964_v49  ;;  %v800_v56 = vsel %vm798_vm4, %v1964_v49, %v797_v42 }
 0x1d3   : > { %v814_v55 = vsel %vm812_vm0, %v1974_v45, %v811_v51  ;;  %836 = vmatpush.msra.mxu2 %v799_v53  ;;  %v647_v51 = vmul.f32 %v2511_v58, %v2491_v28 }
 0x1d4   : > { %855 = vmatpush.msra.mxu3 %v814_v55 }
 0x1d6   : > { %856 = vmatpush.msra.mxu3 %v800_v56  ;;  %v1997_v24 = vpop.permute.xlu2 %1996 }
 0x1d7   : > { %v1967_v57 = vpop.permute.xlu1 %1966  ;;  %v1999_v33 = vunpack.i.h.bf16 %v1997_v24  ;;  %v1998_v34 = vunpack.i.l.bf16 %v1997_v24 }
 0x1d8   : > { %v1969_v12 = vunpack.i.h.bf16 %v1967_v57  ;;  %v1968_v15 = vunpack.i.l.bf16 %v1967_v57 }
 0x1d9   : > { %v735_v40 = vsel %vm3041_vm9, %v1998_v34, %v1999_v33 }
 0x1da   : > { %v772_v60 = vpop.permute.xlu0 %771  ;;  %v760_v30 = vsel %vm759_vm7, %v1968_v15, %v1969_v12  ;;  %v761_v31 = vsel %vm759_vm7, %v1969_v12, %v758_v43 }
 0x1db   : > { %v775_v21 = vsel %vm773_vm6, %v1984_v2, %v772_v60 }
 0x1de   : > { %v719_v49 = vpop.permute.xlu2 %718 }
 0x1df   : > { %v786_v62 = vpop.permute.xlu1 %785 }
 0x1e2   : > { %v1977_v0 = vpop.permute.xlu0 %1976 }
 0x1e3   : > { %v1979_v10 = vunpack.i.h.bf16 %v1977_v0  ;;  %v1978_v11 = vunpack.i.l.bf16 %v1977_v0 }
 0x1e5   : > { %v788_v16 = vsel %vm787_vm5, %v1978_v11, %v1979_v10  ;;  %v789_v19 = vsel %vm787_vm5, %v1979_v10, %v786_v62 }
 0x1e6   : > { %837 = vmatpush.msra.mxu2 %v788_v16  ;;  %857 = vmatpush.msra.mxu3 %v789_v19 }
 0x1e7   : > { %v747_v23 = vpop.permute.xlu1 %746 }
 0x1e8   : > { %838 = vmatpush.msra.mxu2 %v774_v20  ;;  %858 = vmatpush.msra.mxu3 %v775_v21 }
 0x1ea   : > { %839 = vmatpush.msra.mxu2 %v760_v30  ;;  %859 = vmatpush.msra.mxu3 %v761_v31  ;;  %v1987_v32 = vpop.permute.xlu0 %1986 }
 0x1eb   : > { %v1989_v36 = vunpack.i.h.bf16 %v1987_v32  ;;  %v1988_v37 = vunpack.i.l.bf16 %v1987_v32 }
 0x1ed   : > { %v749_v38 = vsel %vm748_vm8, %v1988_v37, %v1989_v36  ;;  %v750_v39 = vsel %vm748_vm8, %v1989_v36, %v747_v23 }
 0x1ee   : > { %840 = vmatpush.msra.mxu2 %v749_v38  ;;  %860 = vmatpush.msra.mxu3 %v750_v39 }
 0x1ef   : > { %v1992_v41 = vpop.permute.xlu1 %1991 }
 0x1f0   : > { %841 = vmatpush.msra.mxu2 %v735_v40  ;;  %v1994_v42 = vunpack.i.h.bf16 %v1992_v41  ;;  %v1993_v43 = vunpack.i.l.bf16 %v1992_v41 }
 0x1f2   : > { %v733_v44 = vpop.permute.xlu0 %732  ;;  %v721_v45 = vsel %vm3040_vm10, %v1993_v43, %v1994_v42  ;;  %v722_v50 = vsel %vm3040_vm10, %v1994_v42, %v719_v49 }
 0x1f3   : > { %v736_v46 = vsel %vm3041_vm9, %v1999_v33, %v733_v44  ;;  %842 = vmatpush.msra.mxu2 %v721_v45 }
 0x1f4   : > { %861 = vmatpush.msra.mxu3 %v736_v46 }
 0x1f5   : > { %843 = vmatpush.msra.mxu2 %v646_v47 }
 0x1f6   : > { %862 = vmatpush.msra.mxu3 %v722_v50  ;;  %1832 = vmatmul.msk.f32.vlgmr.msra.gmra.mxu2 %vm3039_vm11, %v817_v48 }
 0x1f8   : > { %863 = vmatpush.msra.mxu3 %v647_v51 }
 0x1f9   : > { %1833 = vmatmul.msk.f32.vlgmr.msra.gmra.mxu3 %vm3039_vm11, %v817_v48 }
 0x1fa   : > { %v822_v59 = vpop.permute.xlu0 %821 }
 0x279   : > { %v845_v53 = vpop.f32.mrf.mxu2 }
 0x27a   : > { %v846_v55 = vadd.f32 %v845_v53, %v822_v59 }
 0x27c   : > { %v1834_v56 = vmul.f32 -1.442695, %v846_v55  ;;  %v865_v57 = vpop.f32.mrf.mxu3 }
 0x27d   : > { %v866_v60 = vadd.f32 %v865_v57, %v822_v59 }
 0x27e   : > { %2130 = vpow2.f32 %v1834_v56 }
 0x27f   : > { %v1835_v61 = vmul.f32 -1.442695, %v866_v60 }
 0x281   : > { %2132 = vpow2.f32 %v1835_v61 }
 0x284   : > { %v2131_v62 = vpop.eup %2130 }
 0x285   : > { %v874_v0 = vadd.f32 1.0, %v2131_v62 }
 0x287   : > { %v2133_v2 = vpop.eup %2132  ;;  %2134 = vrcp.f32 %v874_v0  ;;  %v887_v15 = vand.u32 2147483648, %v874_v0  ;;  %v885_v20 = vand.u32 2147483647, %v874_v0  ;;  %vm881_vm13 = vweird.f32 %v874_v0 }
 0x288   : > { %v875_v7 = vadd.f32 1.0, %v2133_v2 }
 0x289   : > { %v888_v30 = vor.u32 1.1754944e-38, %v887_v15  ;;  %vm886_vm3 = vcmp.eq.f32.partialorder %v885_v20, 8.507059e+37 }
 0x28a   : > { %2136 = vrcp.f32 %v875_v7  ;;  %v902_v24 = vand.u32 2147483648, %v875_v7  ;;  %v900_v32 = vand.u32 2147483647, %v875_v7  ;;  %vm896_vm11 = vweird.f32 %v875_v7 }
 0x28c   : > { %v903_v38 = vor.u32 1.1754944e-38, %v902_v24  ;;  %vm901_vm9 = vcmp.eq.f32.partialorder %v900_v32, 8.507059e+37 }
 0x28d   : > { %v2135_v10 = vpop.eup %2134 }
 0x28e   : > { %v877_v58 = vmul.f32 %v2135_v10, %v874_v0  ;;  %vm882_vm12 = vweird.f32 %v2135_v10 }
 0x28f   : > { %vm883_vm1 = vmor %vm881_vm13, %vm882_vm12  ;;  %vm3059_vm12 = vcmask 588800  }
 0x290   : > { %v2137_v11 = vpop.eup %2136  ;;  %v878_v12 = vsub.f32 1.0, %v877_v58 }
 0x291   : > { %v892_v16 = vmul.f32 %v2137_v11, %v875_v7  ;;  %vm897_vm2 = vweird.f32 %v2137_v11 }
 0x292   : > { %v879_v19 = vmul.f32 %v2135_v10, %v878_v12  ;;  %vm898_vm10 = vmor %vm896_vm11, %vm897_vm2  ;;  %vm3058_vm11 = vcmask 1039360  }
 0x293   : > { %v893_v21 = vsub.f32 1.0, %v892_v16  ;;  %vm3060_vm13 = vmmov %vm3058_vm11 }
 0x294   : > { %v880_v23 = vadd.f32 %v2135_v10, %v879_v19 }
 0x295   : > { %v894_v31 = vmul.f32 %v2137_v11, %v893_v21 }
 0x296   : > { %v884_v33 = vsel %vm883_vm1, %v2135_v10, %v880_v23  ;;  %vm3061_vm1 = vmmov %vm3059_vm12 }
 0x297   : > { %v889_v34 = vsel %vm886_vm3, %v888_v30, %v884_v33  ;;  %v895_v36 = vadd.f32 %v2137_v11, %v894_v31  ;;  %v1040_v31 = vld [vmem:[%s3023_s6] sm:$0xff] }
 0x298   : > { %v906_v37 = vmul.f32 %v889_v34, %v846_v55 }
 0x299   : > { %v899_v39 = vsel %vm898_vm10, %v2137_v11, %v895_v36 }
 0x29a   : > { %v904_v40 = vsel %vm901_vm9, %v903_v38, %v899_v39  ;;  %910 = vrot.lane.b32.xlu1 %v906_v37, %s2290_s15  ;;  %vm3056_vm9 = vcmask 1031168  }
 0x29b   : > { %v907_v41 = vmul.f32 %v904_v40, %v866_v60  ;;  %vm3057_vm10 = vmmov %vm3056_vm9 }
 0x29d   : > { %912 = vrot.lane.b32.xlu2 %v907_v41, %s2290_s15 }
 0x2f7   : > { %v913_v42 = vpop.permute.xlu2 %912 }
 0x2f8   : > { %920 = vst.msk [vmem:[#allocation2 + $0x10] sm:$0xff] %vm635_vm15, %v913_v42 }
 0x2ff   : > { %v925_v43 = vld [vmem:[#allocation2 + $0x10] sm:$0xff] }
 0x300   : > { %1020 = vrot.lane.b32.xlu0 %v925_v43, %s2294_s17  ;;  %v940_v44 = vmul.f32 %v2519_v63, %v925_v43  ;;  %v934_v45 = vmul.f32 %v2534_v4, %v925_v43  ;;  %v937_v10 = vmul.f32 %v2538_v5, %v925_v43  ;;  %v928_v11 = vmul.f32 %v2574_v25, %v925_v43 }
 0x301   : > { %v931_v15 = vmul.f32 %v2558_v17, %v925_v43 }
 0x302   : > { %1033 = vrot.lane.b32.xlu1 %v940_v44, %s2295_s13 }
 0x308   : > { %984 = vrot.lane.b32.xlu0 %v925_v43, %s2296_s25 }
 0x30a   : > { %997 = vrot.lane.b32.xlu1 %v934_v45, %s2297_s27 }
 0x30c   : > { %v911_v46 = vpop.permute.xlu1 %910 }
 0x30d   : > { %918 = vst.msk [vmem:[#allocation2] sm:$0xff] %vm640_vm14, %v911_v46  ;;  %v2649_v47 = vsel %vm635_vm15, %v911_v46, %v913_v42 }
 0x30e   : > { %v939_v49 = vmul.f32 %v2649_v47, %v2532_v3  ;;  %v936_v53 = vmul.f32 %v2649_v47, %v2554_v14  ;;  %v933_v61 = vmul.f32 %v2649_v47, %v2570_v22  ;;  %v930_v62 = vmul.f32 %v2649_v47, %v2581_v29 }
 0x30f   : > { %v927_v58 = vmul.f32 %v2649_v47, %v2594_v35 }
 0x314   : > { %v2651_v48 = vld [vmem:[#allocation2] sm:$0xff] }
 0x315   : > { %v2000_v50 = vpack.i.bf16 %v2649_v47, %v2651_v48  ;;  %v938_v51 = vmul.f32 %v2526_v1, %v2651_v48  ;;  %v935_v59 = vmul.f32 %v2540_v6, %v2651_v48  ;;  %v932_v57 = vmul.f32 %v2550_v13, %v2651_v48 }
 0x316   : > { %v929_v60 = vmul.f32 %v2560_v18, %v2651_v48  ;;  %v926_v7 = vmul.f32 %v2576_v26, %v2651_v48 }
 0x317   : > { %2001 = vrot.lane.b32.xlu2 %v2000_v50, %s2294_s17  ;;  %v2010_v55 = vpack.i.bf16 %v939_v49, %v938_v51  ;;  %v2015_v56 = vpack.i.bf16 %v936_v53, %v935_v59  ;;  %v2020_v0 = vpack.i.bf16 %v933_v61, %v932_v57 }
 0x318   : > { %v2025_v2 = vpack.i.bf16 %v930_v62, %v929_v60  ;;  %v2035_v12 = vpack.i.bf16 %v927_v58, %v926_v7 }
 0x319   : > { %2011 = vrot.lane.b32.xlu0 %v2010_v55, %s2295_s13  ;;  %2016 = vrot.lane.b32.xlu1 %v2015_v56, %s2298_s14 }
 0x31f   : > { %2006 = vrot.lane.b32.xlu2 %v2000_v50, %s2296_s25 }
 0x321   : > { %2021 = vrot.lane.b32.xlu0 %v2020_v0, %s2297_s27  ;;  %2026 = vrot.lane.b32.xlu1 %v2025_v2, %s2299_s19 }
 0x327   : > { %1010 = vrot.lane.b32.xlu2 %v937_v10, %s2298_s14 }
 0x329   : > { %961 = vrot.lane.b32.xlu1 %v928_v11, %s2300_s23  ;;  %2036 = vrot.lane.b32.xlu0 %v2035_v12, %s2300_s23 }
 0x32f   : > { %974 = vrot.lane.b32.xlu2 %v931_v15, %s2299_s19 }
 0x331   : > { %948 = vrot.lane.b32.xlu0 %v925_v43, %s2301_s18  ;;  %1043 = vperm.xlu1 %2040, %v1040_v31   ;;  %v1039_v31 = vld [vmem:[%s3022_s5] sm:$0xff] }
 0x337   : > { %2031 = vrot.lane.b32.xlu2 %v2000_v50, %s2301_s18 }
 0x371   : > { %v2002_v16 = vpop.permute.xlu2 %2001 }
 0x372   : > { %v1021_v19 = vpop.permute.xlu0 %1020  ;;  %v2004_v34 = vunpack.i.h.bf16 %v2002_v16  ;;  %v2003_v36 = vunpack.i.l.bf16 %v2002_v16 }
 0x374   : > { %v1034_v20 = vpop.permute.xlu1 %1033  ;;  %v1022_v44 = vsel %vm798_vm4, %v2003_v36, %v2004_v34  ;;  %v1023_v45 = vsel %vm798_vm4, %v2004_v34, %v1021_v19  ;;  %v924_v34 = vmul.f32 %v2649_v47, %v2491_v28 }
 0x379   : > { %v2007_v21 = vpop.permute.xlu2 %2006 }
 0x37a   : > { %v985_v23 = vpop.permute.xlu0 %984  ;;  %v2009_v59 = vunpack.i.h.bf16 %v2007_v21  ;;  %v2008_v53 = vunpack.i.l.bf16 %v2007_v21 }
 0x37c   : > { %v998_v24 = vpop.permute.xlu1 %997  ;;  %v986_v0 = vsel %vm759_vm7, %v2008_v53, %v2009_v59  ;;  %v987_v2 = vsel %vm759_vm7, %v2009_v59, %v985_v23 }
 0x381   : > { %v1011_v30 = vpop.permute.xlu2 %1010 }
 0x389   : > { %v975_v43 = vpop.permute.xlu2 %974 }
 0x38b   : > { %v2012_v32 = vpop.permute.xlu0 %2011  ;;  %v2017_v33 = vpop.permute.xlu1 %2016 }
 0x38c   : > { %v2014_v37 = vunpack.i.h.bf16 %v2012_v32  ;;  %v2013_v38 = vunpack.i.l.bf16 %v2012_v32  ;;  %v2019_v39 = vunpack.i.h.bf16 %v2017_v33  ;;  %v2018_v40 = vunpack.i.l.bf16 %v2017_v33 }
 0x38e   : > { %v1035_v41 = vsel %vm812_vm0, %v2013_v38, %v2014_v37  ;;  %v1036_v42 = vsel %vm812_vm0, %v2014_v37, %v1034_v20  ;;  %v1012_v46 = vsel %vm787_vm5, %v2018_v40, %v2019_v39  ;;  %v1013_v49 = vsel %vm787_vm5, %v2019_v39, %v1011_v30 }
 0x38f   : > { %1056 = vmatpush.msrb.mxu0 %v1035_v41  ;;  %1076 = vmatpush.msrb.mxu1 %v1036_v42  ;;  %v923_v30 = vmul.f32 %v2651_v48, %v2488_v27 }
 0x391   : > { %1057 = vmatpush.msrb.mxu0 %v1022_v44  ;;  %1077 = vmatpush.msrb.mxu1 %v1023_v45  ;;  %v2032_v7 = vpop.permute.xlu2 %2031 }
 0x392   : > { %v2034_v12 = vunpack.i.h.bf16 %v2032_v7  ;;  %v2033_v15 = vunpack.i.l.bf16 %v2032_v7 }
 0x393   : > { %v2022_v50 = vpop.permute.xlu0 %2021  ;;  %v2027_v51 = vpop.permute.xlu1 %2026  ;;  %1058 = vmatpush.msrb.mxu0 %v1012_v46  ;;  %1078 = vmatpush.msrb.mxu1 %v1013_v49 }
 0x394   : > { %v2024_v55 = vunpack.i.h.bf16 %v2022_v50  ;;  %v2023_v56 = vunpack.i.l.bf16 %v2022_v50  ;;  %v2029_v57 = vunpack.i.h.bf16 %v2027_v51  ;;  %v2028_v60 = vunpack.i.l.bf16 %v2027_v51 }
 0x395   : > { %v950_v23 = vsel %vm3058_vm11, %v2033_v15, %v2034_v12 }
 0x396   : > { %v999_v61 = vsel %vm773_vm6, %v2023_v56, %v2024_v55  ;;  %v1000_v62 = vsel %vm773_vm6, %v2024_v55, %v998_v24  ;;  %v976_v10 = vsel %vm748_vm8, %v2028_v60, %v2029_v57  ;;  %v977_v58 = vsel %vm748_vm8, %v2029_v57, %v975_v43 }
 0x397   : > { %1059 = vmatpush.msrb.mxu0 %v999_v61  ;;  %1079 = vmatpush.msrb.mxu1 %v1000_v62 }
 0x399   : > { %1060 = vmatpush.msrb.mxu0 %v986_v0  ;;  %1080 = vmatpush.msrb.mxu1 %v987_v2 }
 0x39b   : > { %v2037_v11 = vpop.permute.xlu0 %2036  ;;  %1061 = vmatpush.msrb.mxu0 %v976_v10  ;;  %1081 = vmatpush.msrb.mxu1 %v977_v58  ;;  %v962_v20 = vpop.permute.xlu1 %961 }
 0x39c   : > { %v2039_v16 = vunpack.i.h.bf16 %v2037_v11  ;;  %v2038_v19 = vunpack.i.l.bf16 %v2037_v11 }
 0x39e   : > { %v963_v21 = vsel %vm3056_vm9, %v2038_v19, %v2039_v16  ;;  %v964_v24 = vsel %vm3057_vm10, %v2039_v16, %v962_v20 }
 0x39f   : > { %1062 = vmatpush.msrb.mxu0 %v963_v21  ;;  %1082 = vmatpush.msrb.mxu1 %v964_v24 }
 0x3a1   : > { %1063 = vmatpush.msrb.mxu0 %v950_v23 }
 0x3a3   : > { %v949_v32 = vpop.permute.xlu0 %948  ;;  %1064 = vmatpush.msrb.mxu0 %v923_v30  ;;  %v1044_v36 = vpop.permute.xlu1 %1043 }
 0x3a4   : > { %1836 = vmatmul.msk.f32.vlgmr.msrb.gmra.mxu0 %vm3059_vm12, %v1039_v31  ;;  %v951_v33 = vsel %vm3060_vm13, %v2034_v12, %v949_v32 }
 0x3a5   : > { %1083 = vmatpush.msrb.mxu1 %v951_v33 }
 0x3a7   : > { %1084 = vmatpush.msrb.mxu1 %v924_v34 }
 0x3a8   : > { %1837 = vmatmul.msk.f32.vlgmr.msrb.gmra.mxu1 %vm3061_vm1, %v1039_v31 }
 0x421   : > { %v1066_v37 = vpop.f32.mrf.mxu0 }
 0x422   : > { %v1067_v48 = vadd.f32 %v1066_v37, %v1044_v36 }
 0x424   : > { %v1838_v38 = vmul.f32 -1.442695, %v1067_v48 }
 0x425   : > { %v1086_v39 = vpop.f32.mrf.mxu1 }
 0x426   : > { %2138 = vpow2.f32 %v1838_v38  ;;  %v1087_v40 = vadd.f32 %v1086_v39, %v1044_v36 }
 0x428   : > { %v1839_v41 = vmul.f32 -1.442695, %v1087_v40 }
 0x42a   : > { %2140 = vpow2.f32 %v1839_v41 }
 0x42c   : > { %v2139_v42 = vpop.eup %2138 }
 0x42d   : > { %v1095_v43 = vadd.f32 1.0, %v2139_v42 }
 0x42f   : > { %2142 = vrcp.f32 %v1095_v43  ;;  %v1106_v51 = vand.u32 2147483647, %v1095_v43  ;;  %v1108_v59 = vand.u32 2147483648, %v1095_v43  ;;  %vm1102_vm3 = vweird.f32 %v1095_v43 }
 0x430   : > { %v2141_v44 = vpop.eup %2140 }
 0x431   : > { %v1096_v45 = vadd.f32 1.0, %v2141_v44  ;;  %vm1107_vm10 = vcmp.eq.f32.partialorder %v1106_v51, 8.507059e+37  ;;  %v1109_v60 = vor.u32 1.1754944e-38, %v1108_v59 }
 0x433   : > { %2144 = vrcp.f32 %v1096_v45  ;;  %v1123_v61 = vand.u32 2147483648, %v1096_v45  ;;  %v1121_v2 = vand.u32 2147483647, %v1096_v45  ;;  %vm1117_vm12 = vweird.f32 %v1096_v45 }
 0x435   : > { %v2143_v46 = vpop.eup %2142  ;;  %v1124_v11 = vor.u32 1.1754944e-38, %v1123_v61  ;;  %vm1122_vm1 = vcmp.eq.f32.partialorder %v1121_v2, 8.507059e+37 }
 0x436   : > { %v1098_v47 = vmul.f32 %v2143_v46, %v1095_v43  ;;  %vm1103_vm2 = vweird.f32 %v2143_v46 }
 0x437   : > { %vm1104_vm9 = vmor %vm1102_vm3, %vm1103_vm2  ;;  %vm3062_vm2 = vcmask 1031168  }
 0x438   : > { %v1099_v49 = vsub.f32 1.0, %v1098_v47  ;;  %vm3063_vm3 = vmmov %vm3062_vm2 }
 0x439   : > { %v2145_v50 = vpop.eup %2144 }
 0x43a   : > { %v1100_v53 = vmul.f32 %v2143_v46, %v1099_v49  ;;  %v1113_v55 = vmul.f32 %v2145_v50, %v1096_v45  ;;  %vm1118_vm11 = vweird.f32 %v2145_v50 }
 0x43b   : > { %vm1119_vm13 = vmor %vm1117_vm12, %vm1118_vm11 }
 0x43c   : > { %v1101_v56 = vadd.f32 %v2143_v46, %v1100_v53  ;;  %v1114_v57 = vsub.f32 1.0, %v1113_v55 }
 0x43e   : > { %v1105_v62 = vsel %vm1104_vm9, %v2143_v46, %v1101_v56  ;;  %v1115_v0 = vmul.f32 %v2145_v50, %v1114_v57  ;;  %vm3064_vm9 = vcmask 1039360  }
 0x43f   : > { %v1110_v7 = vsel %vm1107_vm10, %v1109_v60, %v1105_v62  ;;  %v1263_v62 = vld [vmem:[%s3025_s8] sm:$0xff]  ;;  %vm3065_vm10 = vcmask 588800   ;;  %vm3066_vm11 = vmmov %vm3064_vm9 }
 0x440   : > { %v1127_v10 = vmul.f32 %v1110_v7, %v1067_v48  ;;  %v1116_v58 = vadd.f32 %v2145_v50, %v1115_v0  ;;  %vm3067_vm12 = vmmov %vm3065_vm10 }
 0x442   : > { %v2719_v12 = vadd.f32 %v1127_v10, %v2497_v52  ;;  %v1120_v15 = vsel %vm1119_vm13, %v2145_v50, %v1116_v58 }
 0x443   : > { %v1125_v16 = vsel %vm1122_vm1, %v1124_v11, %v1120_v15 }
 0x444   : > { %v1128_v19 = vmul.f32 %v1125_v16, %v1087_v40  ;;  %1133 = vrot.lane.b32.xlu2 %v2719_v12, %s2290_s15 }
 0x446   : > { %v2724_v20 = vadd.f32 %v1128_v19, %v2499_v54 }
 0x448   : > { %1135 = vrot.lane.b32.xlu0 %v2724_v20, %s2290_s15 }
 0x49e   : > { %v1134_v21 = vpop.permute.xlu2 %1133 }
 0x49f   : > { %1141 = vst.msk [vmem:[#allocation2] sm:$0xff] %vm640_vm14, %v1134_v21 }
 0x4a6   : > { %v2733_v23 = vld [vmem:[#allocation2] sm:$0xff] }
 0x4a7   : > { %v1161_v36 = vmul.f32 %v2526_v1, %v2733_v23  ;;  %v1158_v38 = vmul.f32 %v2540_v6, %v2733_v23  ;;  %v1155_v42 = vmul.f32 %v2550_v13, %v2733_v23  ;;  %v1152_v45 = vmul.f32 %v2560_v18, %v2733_v23 }
 0x4a8   : > { %v1149_v49 = vmul.f32 %v2576_v26, %v2733_v23 }
 0x4ba   : > { %v1136_v24 = vpop.permute.xlu0 %1135 }
 0x4bb   : > { %v2730_v52 = vsel %vm635_vm15, %v1134_v21, %v1136_v24  ;;  %1143 = vst.msk [vmem:[#allocation2 + $0x10] sm:$0xff] %vm635_vm15, %v1136_v24 }
 0x4bc   : > { %v2041_v30 = vpack.i.bf16 %v2730_v52, %v2733_v23  ;;  %v1162_v34 = vmul.f32 %v2730_v52, %v2532_v3  ;;  %v1159_v37 = vmul.f32 %v2730_v52, %v2554_v14  ;;  %v1156_v41 = vmul.f32 %v2730_v52, %v2570_v22 }
 0x4bd   : > { %v1153_v43 = vmul.f32 %v2730_v52, %v2581_v29  ;;  %v1150_v47 = vmul.f32 %v2730_v52, %v2594_v35 }
 0x4be   : > { %2042 = vrot.lane.b32.xlu0 %v2041_v30, %s2294_s17  ;;  %v2051_v48 = vpack.i.bf16 %v1162_v34, %v1161_v36  ;;  %v2056_v39 = vpack.i.bf16 %v1159_v37, %v1158_v38  ;;  %v2061_v44 = vpack.i.bf16 %v1156_v41, %v1155_v42 }
 0x4bf   : > { %v2066_v46 = vpack.i.bf16 %v1153_v43, %v1152_v45  ;;  %v2076_v50 = vpack.i.bf16 %v1150_v47, %v1149_v49 }
 0x4c2   : > { %v1148_v54 = vld [vmem:[#allocation2 + $0x10] sm:$0xff] }
 0x4c3   : > { %1243 = vrot.lane.b32.xlu1 %v1148_v54, %s2294_s17  ;;  %v1163_v31 = vmul.f32 %v2519_v63, %v1148_v54  ;;  %v1157_v32 = vmul.f32 %v2534_v4, %v1148_v54  ;;  %v1160_v33 = vmul.f32 %v2538_v5, %v1148_v54  ;;  %v1154_v40 = vmul.f32 %v2558_v17, %v1148_v54 }
 0x4c4   : > { %v1151_v51 = vmul.f32 %v2574_v25, %v1148_v54 }
 0x4c5   : > { %1256 = vrot.lane.b32.xlu2 %v1163_v31, %s2295_s13 }
 0x4c6   : > { %2047 = vrot.lane.b32.xlu0 %v2041_v30, %s2296_s25 }
 0x4cb   : > { %1207 = vrot.lane.b32.xlu1 %v1148_v54, %s2296_s25 }
 0x4cd   : > { %1220 = vrot.lane.b32.xlu2 %v1157_v32, %s2297_s27 }
 0x4ce   : > { %1233 = vrot.lane.b32.xlu0 %v1160_v33, %s2298_s14 }
 0x4d3   : > { %2052 = vrot.lane.b32.xlu1 %v2051_v48, %s2295_s13 }
 0x4d5   : > { %2057 = vrot.lane.b32.xlu2 %v2056_v39, %s2298_s14 }
 0x4d6   : > { %1197 = vrot.lane.b32.xlu0 %v1154_v40, %s2299_s19 }
 0x4db   : > { %2062 = vrot.lane.b32.xlu1 %v2061_v44, %s2297_s27 }
 0x4dd   : > { %2067 = vrot.lane.b32.xlu2 %v2066_v46, %s2299_s19 }
 0x4de   : > { %2072 = vrot.lane.b32.xlu0 %v2041_v30, %s2301_s18 }
 0x4e3   : > { %2077 = vrot.lane.b32.xlu1 %v2076_v50, %s2300_s23 }
 0x4e5   : > { %1184 = vrot.lane.b32.xlu2 %v1151_v51, %s2300_s23 }
 0x4eb   : > { %1171 = vrot.lane.b32.xlu1 %v1148_v54, %s2301_s18 }
 0x4ed   : > { %1266 = vperm.xlu2 %2081, %v1263_v62   ;;  %v1262_v62 = vld [vmem:[%s3024_s7] sm:$0xff] }
 0x51f   : > { %v1257_v59 = vpop.permute.xlu2 %1256 }
 0x527   : > { %v1221_v57 = vpop.permute.xlu2 %1220 }
 0x52f   : > { %v2058_v0 = vpop.permute.xlu2 %2057 }
 0x530   : > { %v2043_v53 = vpop.permute.xlu0 %2042  ;;  %v2060_v15 = vunpack.i.h.bf16 %v2058_v0  ;;  %v2059_v16 = vunpack.i.l.bf16 %v2058_v0 }
 0x531   : > { %v2045_v7 = vunpack.i.h.bf16 %v2043_v53  ;;  %v2044_v10 = vunpack.i.l.bf16 %v2043_v53 }
 0x532   : > { %v1235_v31 = vsel %vm787_vm5, %v2059_v16, %v2060_v15 }
 0x533   : > { %v1245_v30 = vsel %vm798_vm4, %v2044_v10, %v2045_v7 }
 0x535   : > { %v1244_v55 = vpop.permute.xlu1 %1243 }
 0x536   : > { %v1246_v54 = vsel %vm798_vm4, %v2045_v7, %v1244_v55  ;;  %v1147_v7 = vmul.f32 %v2730_v52, %v2491_v28 }
 0x537   : > { %v2068_v33 = vpop.permute.xlu2 %2067 }
 0x538   : > { %v2048_v56 = vpop.permute.xlu0 %2047  ;;  %v2070_v39 = vunpack.i.h.bf16 %v2068_v33  ;;  %v2069_v40 = vunpack.i.l.bf16 %v2068_v33 }
 0x539   : > { %v2050_v36 = vunpack.i.h.bf16 %v2048_v56  ;;  %v2049_v37 = vunpack.i.l.bf16 %v2048_v56 }
 0x53a   : > { %v1199_v46 = vsel %vm748_vm8, %v2069_v40, %v2070_v39 }
 0x53b   : > { %v1209_v43 = vsel %vm759_vm7, %v2049_v37, %v2050_v36 }
 0x53d   : > { %v1208_v60 = vpop.permute.xlu1 %1207 }
 0x53e   : > { %v1210_v44 = vsel %vm759_vm7, %v2050_v36, %v1208_v60 }
 0x53f   : > { %v1185_v55 = vpop.permute.xlu2 %1184 }
 0x540   : > { %v1234_v61 = vpop.permute.xlu0 %1233 }
 0x541   : > { %v1236_v32 = vsel %vm787_vm5, %v2060_v15, %v1234_v61  ;;  %v1146_v61 = vmul.f32 %v2733_v23, %v2488_v27 }
 0x545   : > { %v2053_v2 = vpop.permute.xlu1 %2052 }
 0x546   : > { %v2055_v58 = vunpack.i.h.bf16 %v2053_v2  ;;  %v2054_v11 = vunpack.i.l.bf16 %v2053_v2 }
 0x547   : > { %v1267_v10 = vpop.permute.xlu2 %1266 }
 0x548   : > { %v1258_v19 = vsel %vm812_vm0, %v2054_v11, %v2055_v58  ;;  %v1259_v21 = vsel %vm812_vm0, %v2055_v58, %v1257_v59  ;;  %v1198_v24 = vpop.permute.xlu0 %1197 }
 0x549   : > { %1279 = vmatpush.msrb.mxu2 %v1258_v19  ;;  %1299 = vmatpush.msrb.mxu3 %v1259_v21  ;;  %v1200_v47 = vsel %vm748_vm8, %v2070_v39, %v1198_v24 }
 0x54b   : > { %1280 = vmatpush.msrb.mxu2 %v1245_v30  ;;  %1300 = vmatpush.msrb.mxu3 %v1246_v54 }
 0x54d   : > { %v2063_v34 = vpop.permute.xlu1 %2062  ;;  %1281 = vmatpush.msrb.mxu2 %v1235_v31  ;;  %1301 = vmatpush.msrb.mxu3 %v1236_v32 }
 0x54e   : > { %v2065_v48 = vunpack.i.h.bf16 %v2063_v34  ;;  %v2064_v38 = vunpack.i.l.bf16 %v2063_v34 }
 0x550   : > { %v1222_v41 = vsel %vm773_vm6, %v2064_v38, %v2065_v48  ;;  %v1223_v42 = vsel %vm773_vm6, %v2065_v48, %v1221_v57  ;;  %v2073_v45 = vpop.permute.xlu0 %2072 }
 0x551   : > { %1282 = vmatpush.msrb.mxu2 %v1222_v41  ;;  %1302 = vmatpush.msrb.mxu3 %v1223_v42  ;;  %v2075_v59 = vunpack.i.h.bf16 %v2073_v45  ;;  %v2074_v53 = vunpack.i.l.bf16 %v2073_v45 }
 0x553   : > { %1283 = vmatpush.msrb.mxu2 %v1209_v43  ;;  %1303 = vmatpush.msrb.mxu3 %v1210_v44  ;;  %v1173_v60 = vsel %vm3064_vm9, %v2074_v53, %v2075_v59 }
 0x555   : > { %v2078_v49 = vpop.permute.xlu1 %2077  ;;  %1284 = vmatpush.msrb.mxu2 %v1199_v46  ;;  %1304 = vmatpush.msrb.mxu3 %v1200_v47 }
 0x556   : > { %v2080_v50 = vunpack.i.h.bf16 %v2078_v49  ;;  %v2079_v51 = vunpack.i.l.bf16 %v2078_v49 }
 0x558   : > { %v1186_v56 = vsel %vm3062_vm2, %v2079_v51, %v2080_v50  ;;  %v1187_v57 = vsel %vm3063_vm3, %v2080_v50, %v1185_v55 }
 0x559   : > { %1285 = vmatpush.msrb.mxu2 %v1186_v56  ;;  %1305 = vmatpush.msrb.mxu3 %v1187_v57 }
 0x55b   : > { %1286 = vmatpush.msrb.mxu2 %v1173_v60 }
 0x55d   : > { %v1172_v0 = vpop.permute.xlu1 %1171  ;;  %1287 = vmatpush.msrb.mxu2 %v1146_v61 }
 0x55e   : > { %1840 = vmatmul.msk.f32.vlgmr.msrb.gmra.mxu2 %vm3065_vm10, %v1262_v62  ;;  %v1174_v2 = vsel %vm3066_vm11, %v2075_v59, %v1172_v0 }
 0x55f   : > { %1306 = vmatpush.msrb.mxu3 %v1174_v2 }
 0x561   : > { %1307 = vmatpush.msrb.mxu3 %v1147_v7 }
 0x562   : > { %1841 = vmatmul.msk.f32.vlgmr.msrb.gmra.mxu3 %vm3067_vm12, %v1262_v62 }
 0x5e1   : > { %v1289_v58 = vpop.f32.mrf.mxu2 }
 0x5e2   : > { %v1290_v23 = vadd.f32 %v1289_v58, %v1267_v10 }
 0x5e4   : > { %v1842_v11 = vmul.f32 -1.442695, %v1290_v23 }
 0x5e5   : > { %v1309_v15 = vpop.f32.mrf.mxu3 }
 0x5e6   : > { %2146 = vpow2.f32 %v1842_v11  ;;  %v1310_v16 = vadd.f32 %v1309_v15, %v1267_v10 }
 0x5e8   : > { %v1843_v19 = vmul.f32 -1.442695, %v1310_v16 }
 0x5ea   : > { %2148 = vpow2.f32 %v1843_v19 }
 0x5ec   : > { %v2147_v21 = vpop.eup %2146 }
 0x5ed   : > { %v1318_v24 = vadd.f32 1.0, %v2147_v21 }
 0x5ef   : > { %2150 = vrcp.f32 %v1318_v24  ;;  %v1329_v34 = vand.u32 2147483647, %v1318_v24  ;;  %v1331_v36 = vand.u32 2147483648, %v1318_v24  ;;  %vm1325_vm1 = vweird.f32 %v1318_v24 }
 0x5f0   : > { %v2149_v30 = vpop.eup %2148 }
 0x5f1   : > { %v1319_v54 = vadd.f32 1.0, %v2149_v30  ;;  %vm1330_vm3 = vcmp.eq.f32.partialorder %v1329_v34, 8.507059e+37  ;;  %v1332_v40 = vor.u32 1.1754944e-38, %v1331_v36 }
 0x5f3   : > { %2152 = vrcp.f32 %v1319_v54  ;;  %v1346_v41 = vand.u32 2147483648, %v1319_v54  ;;  %v1344_v44 = vand.u32 2147483647, %v1319_v54  ;;  %vm1340_vm10 = vweird.f32 %v1319_v54 }
 0x5f5   : > { %v2151_v31 = vpop.eup %2150  ;;  %v1347_v49 = vor.u32 1.1754944e-38, %v1346_v41  ;;  %vm1345_vm12 = vcmp.eq.f32.partialorder %v1344_v44, 8.507059e+37 }
 0x5f6   : > { %v1321_v52 = vmul.f32 %v2151_v31, %v1318_v24  ;;  %vm1326_vm13 = vweird.f32 %v2151_v31 }
 0x5f7   : > { %vm1327_vm2 = vmor %vm1325_vm1, %vm1326_vm13 }
 0x5f8   : > { %v1322_v32 = vsub.f32 1.0, %v1321_v52 }
 0x5f9   : > { %v2153_v33 = vpop.eup %2152 }
 0x5fa   : > { %v1323_v37 = vmul.f32 %v2151_v31, %v1322_v32  ;;  %v1336_v48 = vmul.f32 %v2153_v33, %v1319_v54  ;;  %vm1341_vm9 = vweird.f32 %v2153_v33 }
 0x5fb   : > { %vm1342_vm11 = vmor %vm1340_vm10, %vm1341_vm9 }
 0x5fc   : > { %v1324_v38 = vadd.f32 %v2151_v31, %v1323_v37  ;;  %v1337_v39 = vsub.f32 1.0, %v1336_v48 }
 0x5fe   : > { %v1328_v42 = vsel %vm1327_vm2, %v2151_v31, %v1324_v38  ;;  %v1338_v43 = vmul.f32 %v2153_v33, %v1337_v39 }
 0x5ff   : > { %v1333_v45 = vsel %vm1330_vm3, %v1332_v40, %v1328_v42 }
 0x600   : > { %v1350_v46 = vmul.f32 %v1333_v45, %v1290_v23  ;;  %v1339_v47 = vadd.f32 %v2153_v33, %v1338_v43 }
 0x602   : > { %v1343_v50 = vsel %vm1342_vm11, %v2153_v33, %v1339_v47  ;;  %1354 = vrot.lane.b32.xlu0 %v1350_v46, %s2290_s15 }
 0x603   : > { %v1348_v51 = vsel %vm1345_vm12, %v1347_v49, %v1343_v50 }
 0x604   : > { %v1351_v59 = vmul.f32 %v1348_v51, %v1310_v16 }
 0x606   : > { %1356 = vrot.lane.b32.xlu1 %v1351_v59, %s2290_s15 }
 0x674   : > { %v1355_v53 = vpop.permute.xlu0 %1354 }
 0x675   : > { %1362 = vst.msk [vmem:[#allocation2] sm:$0xff] %vm640_vm14, %v1355_v53  ;;  %vm3068_vm14 = vcmask 1031168  }
 0x678   : > { %v1357_v55 = vpop.permute.xlu1 %1356 }
 0x679   : > { %v2810_v56 = vsel %vm635_vm15, %v1355_v53, %v1357_v55  ;;  %1364 = vst.msk [vmem:[#allocation2 + $0x10] sm:$0xff] %vm635_vm15, %v1357_v55  ;;  %vm3069_vm15 = vcmask 1039360  }
 0x67a   : > { %v1383_v7 = vmul.f32 %v2810_v56, %v2532_v3  ;;  %v1380_v23 = vmul.f32 %v2810_v56, %v2554_v14  ;;  %v1377_v3 = vmul.f32 %v2810_v56, %v2570_v22  ;;  %v1374_v14 = vmul.f32 %v2810_v56, %v2581_v29  ;;  %v484_v29 = vld [vmem:[%s3019_s2] sm:$0xff] }
 0x67b   : > { %v1371_v22 = vmul.f32 %v2810_v56, %v2594_v35  ;;  %v1577_v35 = vld [vmem:[%s3029_s12] sm:$0xff] }
 0x67c   : > { %v2813_v57 = vld [vmem:[#allocation2] sm:$0xff] }
 0x67d   : > { %v2082_v60 = vpack.i.bf16 %v2810_v56, %v2813_v57  ;;  %v1382_v2 = vmul.f32 %v2526_v1, %v2813_v57  ;;  %v1379_v10 = vmul.f32 %v2540_v6, %v2813_v57  ;;  %v1376_v1 = vmul.f32 %v2550_v13, %v2813_v57 }
 0x67e   : > { %v1370_v13 = vmul.f32 %v2576_v26, %v2813_v57  ;;  %v1484_v26 = vld [vmem:[%s3027_s10] sm:$0xff] }
 0x67f   : > { %2083 = vrot.lane.b32.xlu1 %v2082_v60, %s2294_s17  ;;  %v2092_v58 = vpack.i.bf16 %v1383_v7, %v1382_v2  ;;  %v2102_v11 = vpack.i.bf16 %v1377_v3, %v1376_v1 }
 0x680   : > { %v1369_v61 = vld [vmem:[#allocation2 + $0x10] sm:$0xff] }
 0x681   : > { %1464 = vrot.lane.b32.xlu2 %v1369_v61, %s2294_s17  ;;  %v1384_v62 = vmul.f32 %v2519_v63, %v1369_v61  ;;  %v1378_v0 = vmul.f32 %v2534_v4, %v1369_v61  ;;  %v1381_v63 = vmul.f32 %v2538_v5, %v1369_v61  ;;  %v2097_v4 = vpack.i.bf16 %v1380_v23, %v1379_v10 }
 0x682   : > { %v1373_v5 = vmul.f32 %v2560_v18, %v2813_v57  ;;  %v1375_v6 = vmul.f32 %v2558_v17, %v1369_v61  ;;  %v2117_v18 = vpack.i.bf16 %v1371_v22, %v1370_v13  ;;  %v1372_v17 = vmul.f32 %v2574_v25, %v1369_v61  ;;  %v1578_v25 = vld [vmem:[%s3029_s12 + $0x8] sm:$0xff] }
 0x683   : > { %1477 = vrot.lane.b32.xlu0 %v1384_v62, %s2295_s13 }
 0x684   : > { %v2107_v15 = vpack.i.bf16 %v1374_v14, %v1373_v5  ;;  %v1483_v14 = vld [vmem:[%s3026_s9] sm:$0xff] }
 0x687   : > { %2088 = vrot.lane.b32.xlu1 %v2082_v60, %s2296_s25 }
 0x689   : > { %1428 = vrot.lane.b32.xlu2 %v1369_v61, %s2296_s25  ;;  %s2971_s25 = scalar_lea.vmem [#allocation6], %s1822_s20  ;;  %s3076_s20 = sld [smem:[#allocation16_spill]] }
 0x68b   : > { %1441 = vrot.lane.b32.xlu0 %v1378_v0, %s2297_s27 }
 0x68f   : > { %1454 = vrot.lane.b32.xlu1 %v1381_v63, %s2298_s14 }
 0x691   : > { %2093 = vrot.lane.b32.xlu2 %v2092_v58, %s2295_s13  ;;  %s1862_s13 = sshll.u32 %s2394_s29, 5 }
 0x693   : > { %2098 = vrot.lane.b32.xlu0 %v2097_v4, %s2298_s14  ;;  %s1738_s14 = scalar_lea.hbm %s3076_s20, %s1862_s13  ;;  %s2236_s13 = scalar_lea.hbm %s3076_s20, 64 }
 0x697   : > { %1418 = vrot.lane.b32.xlu1 %v1375_v6, %s2299_s19 }
 0x699   : > { %2103 = vrot.lane.b32.xlu2 %v2102_v11, %s2297_s27  ;;  %v1367_v11 = vmul.f32 %v2813_v57, %v2488_v27 }
 0x69b   : > { %2108 = vrot.lane.b32.xlu0 %v2107_v15, %s2299_s19  ;;  %s1739_s19 = sshll.u32 %s2971_s25, 4  ;;  %s1740_s19 = int_to_ptr.vmem [resolvable:$true] %s1739_s19 }
 0x69f   : > { %2113 = vrot.lane.b32.xlu1 %v2082_v60, %s2301_s18 }
 0x6a1   : > { %2118 = vrot.lane.b32.xlu2 %v2117_v18, %s2300_s23  ;;  %v1368_v18 = vmul.f32 %v2810_v56, %v2491_v28 }
 0x6a3   : > { %1405 = vrot.lane.b32.xlu0 %v1372_v17, %s2300_s23  ;;  %s1741_s23 = sshll.u32 %s1738_s14, 4  ;;  %s1742_s23 = int_to_ptr.hbm [resolvable:$true] %s1741_s23 }
 0x6a4   : > { %s2230_s16 = sshra.s32 %s1742_s23, 4  ;;  %s2231_s16 = int_to_ptr.hbm [resolvable:$true] %s2230_s16 }
 0x6a5   : > { %s2232_s21 = scalar_lea.hbm %s2231_s16, 32  ;;  %p2237_p0 = scmp.lt.s32.totalorder %s2231_s16, %s3076_s20 }
 0x6a6   : > { %p2233_p6 = scmp.ne.s32.totalorder %s2231_s16, %s2232_s21  ;;  %p2238_p1 = scmp.lt.s32.totalorder %s2236_s13, %s2232_s21 }
 0x6a7   : > { %488 = vperm.xlu1 %2040, %v484_v29  }
 0x6a8   : > { %p2234_p9 = pnand %p2233_p6, %p2423_p11  ;;  %p2239_p3 = por %p2238_p1, %p2237_p0 }
 0x6a9   : > { %1392 = vrot.lane.b32.xlu2 %v1369_v61, %s2301_s18  ;;  %s1727_s18 = scalar_lea.sflag [#allocation5], %s2459_s30 }
 0x6aa   : > { %p2235_p13 = pneg %p2234_p9 }
 0x6ab   : > { %1487 = vperm.xlu0 %1934, %v1484_v26  }
 0x6ac   : > { %p2240_p4 = pnand %p2239_p3, %p2235_p13 }
 0x6b1   : > { %1581 = vperm.xlu2 %2081, %v1577_v35  }
 0x6b3   : > { %1586 = vperm.xlu0 %1934, %v1578_v25  }
 0x6db   : > { %v1465_v16 = vpop.permute.xlu2 %1464 }
 0x6e3   : > { %v1429_v19 = vpop.permute.xlu2 %1428 }
 0x6eb   : > { %v2094_v21 = vpop.permute.xlu2 %2093 }
 0x6ec   : > { %v2096_v24 = vunpack.i.h.bf16 %v2094_v21  ;;  %v2095_v30 = vunpack.i.l.bf16 %v2094_v21 }
 0x6ee   : > { %v1479_v54 = vsel %vm812_vm0, %v2095_v30, %v2096_v24 }
 0x6ef   : > { %1500 = vmatpush.msra.mxu0 %v1479_v54 }
 0x6f1   : > { %v2084_v31 = vpop.permute.xlu1 %2083 }
 0x6f2   : > { %v2086_v52 = vunpack.i.h.bf16 %v2084_v31  ;;  %v2085_v32 = vunpack.i.l.bf16 %v2084_v31 }
 0x6f3   : > { %v2104_v39 = vpop.permute.xlu2 %2103 }
 0x6f4   : > { %v1466_v33 = vsel %vm798_vm4, %v2085_v32, %v2086_v52  ;;  %v1467_v37 = vsel %vm798_vm4, %v2086_v52, %v1465_v16  ;;  %v2106_v42 = vunpack.i.h.bf16 %v2104_v39  ;;  %v2105_v43 = vunpack.i.l.bf16 %v2104_v39  ;;  %vm3071_vm4 = vmmov %vm3069_vm15 }
 0x6f5   : > { %v1478_v34 = vpop.permute.xlu0 %1477  ;;  %1501 = vmatpush.msra.mxu0 %v1466_v33 }
 0x6f6   : > { %v1480_v36 = vsel %vm812_vm0, %v2096_v24, %v1478_v34  ;;  %v1443_v59 = vsel %vm773_vm6, %v2105_v43, %v2106_v42  ;;  %vm3070_vm0 = vmmov %vm3068_vm14 }
 0x6f7   : > { %1520 = vmatpush.msra.mxu1 %v1480_v36 }
 0x6f9   : > { %1521 = vmatpush.msra.mxu1 %v1467_v37  ;;  %v2089_v48 = vpop.permute.xlu1 %2088 }
 0x6fa   : > { %v2091_v46 = vunpack.i.h.bf16 %v2089_v48  ;;  %v2090_v47 = vunpack.i.l.bf16 %v2089_v48 }
 0x6fb   : > { %v2119_v55 = vpop.permute.xlu2 %2118 }
 0x6fc   : > { %v1430_v60 = vsel %vm759_vm7, %v2090_v47, %v2091_v46  ;;  %v1431_v61 = vsel %vm759_vm7, %v2091_v46, %v1429_v19  ;;  %v2121_v0 = vunpack.i.h.bf16 %v2119_v55  ;;  %v2120_v2 = vunpack.i.l.bf16 %v2119_v55 }
 0x6fd   : > { %v1442_v38 = vpop.permute.xlu0 %1441 }
 0x6fe   : > { %v1444_v53 = vsel %vm773_vm6, %v2106_v42, %v1442_v38  ;;  %v1407_v4 = vsel %vm3068_vm14, %v2120_v2, %v2121_v0 }
 0x701   : > { %v1455_v40 = vpop.permute.xlu1 %1454 }
 0x703   : > { %v1393_v13 = vpop.permute.xlu2 %1392 }
 0x705   : > { %v2099_v41 = vpop.permute.xlu0 %2098 }
 0x706   : > { %v2101_v44 = vunpack.i.h.bf16 %v2099_v41  ;;  %v2100_v45 = vunpack.i.l.bf16 %v2099_v41 }
 0x708   : > { %v1456_v49 = vsel %vm787_vm5, %v2100_v45, %v2101_v44  ;;  %v1457_v50 = vsel %vm787_vm5, %v2101_v44, %v1455_v40  ;;  %vm3072_vm5 = vcmask 588800  }
 0x709   : > { %1502 = vmatpush.msra.mxu0 %v1456_v49  ;;  %1522 = vmatpush.msra.mxu1 %v1457_v50  ;;  %v1419_v51 = vpop.permute.xlu1 %1418  ;;  %vm3073_vm6 = vmmov %vm3072_vm5 }
 0x70b   : > { %1503 = vmatpush.msra.mxu0 %v1443_v59  ;;  %1523 = vmatpush.msra.mxu1 %v1444_v53 }
 0x70d   : > { %v2109_v62 = vpop.permute.xlu0 %2108  ;;  %1504 = vmatpush.msra.mxu0 %v1430_v60  ;;  %1524 = vmatpush.msra.mxu1 %v1431_v61 }
 0x70e   : > { %v2111_v7 = vunpack.i.h.bf16 %v2109_v62  ;;  %v2110_v10 = vunpack.i.l.bf16 %v2109_v62 }
 0x710   : > { %v1420_v63 = vsel %vm748_vm8, %v2110_v10, %v2111_v7  ;;  %v1421_v58 = vsel %vm748_vm8, %v2111_v7, %v1419_v51 }
 0x711   : > { %1505 = vmatpush.msra.mxu0 %v1420_v63  ;;  %1525 = vmatpush.msra.mxu1 %v1421_v58  ;;  %v2114_v23 = vpop.permute.xlu1 %2113 }
 0x712   : > { %v2116_v1 = vunpack.i.h.bf16 %v2114_v23  ;;  %v2115_v3 = vunpack.i.l.bf16 %v2114_v23 }
 0x713   : > { %1506 = vmatpush.msra.mxu0 %v1407_v4 }
 0x714   : > { %v1394_v5 = vsel %vm3069_vm15, %v2115_v3, %v2116_v1  ;;  %v1395_v22 = vsel %vm3071_vm4, %v2116_v1, %v1393_v13 }
 0x715   : > { %v1406_v6 = vpop.permute.xlu0 %1405  ;;  %1507 = vmatpush.msra.mxu0 %v1394_v5 }
 0x716   : > { %v1408_v15 = vsel %vm3070_vm0, %v2121_v0, %v1406_v6 }
 0x717   : > { %1526 = vmatpush.msra.mxu1 %v1408_v15  ;;  %1508 = vmatpush.msra.mxu0 %v1367_v11 }
 0x718   : > { %1844 = vmatmul.msk.f32.vlgmr.msra.gmra.mxu0 %vm3072_vm5, %v1483_v14 }
 0x719   : > { %1527 = vmatpush.msra.mxu1 %v1395_v22  ;;  %v489_v27 = vpop.permute.xlu1 %488 }
 0x71a   : > { %v2896_v57 = vadd.f32 %v2482_v8, %v489_v27  ;;  %v2899_v17 = vadd.f32 %v2484_v9, %v489_v27 }
 0x71b   : > { %1528 = vmatpush.msra.mxu1 %v1368_v18 }
 0x71c   : > { %1845 = vmatmul.msk.f32.vlgmr.msra.gmra.mxu1 %vm3073_vm6, %v1483_v14  ;;  %v1828_v29 = vmul.f32 -1.442695, %v2896_v57  ;;  %v1829_v26 = vmul.f32 -1.442695, %v2899_v17 }
 0x71d   : > { %v1488_v25 = vpop.permute.xlu0 %1487 }
 0x71e   : > { %2154 = vpow2.f32 %v1828_v29 }
 0x71f   : > { %2156 = vpow2.f32 %v1829_v26 }
 0x724   : > { %v2155_v35 = vpop.eup %2154 }
 0x725   : > { %v2157_v56 = vpop.eup %2156  ;;  %v2903_v19 = vadd.f32 1.0, %v2155_v35 }
 0x726   : > { %v2907_v9 = vadd.f32 1.0, %v2157_v56 }
 0x727   : > { %vm570_vm8 = vweird.f32 %v2903_v19  ;;  %v576_v49 = vand.u32 2147483648, %v2903_v19  ;;  %v574_v2 = vand.u32 2147483647, %v2903_v19 }
 0x728   : > { %vm585_vm10 = vweird.f32 %v2907_v9  ;;  %v589_v1 = vand.u32 2147483647, %v2907_v9  ;;  %v591_v3 = vand.u32 2147483648, %v2907_v9 }
 0x729   : > { %v577_v6 = vor.u32 1.1754944e-38, %v576_v49  ;;  %vm575_vm4 = vcmp.eq.f32.partialorder %v574_v2, 8.507059e+37 }
 0x72a   : > { %v592_v27 = vor.u32 1.1754944e-38, %v591_v3  ;;  %vm590_vm6 = vcmp.eq.f32.partialorder %v589_v1, 8.507059e+37 }
 0x795   : > { %v1510_v16 = vpop.f32.mrf.mxu0 }
 0x796   : > { %v1511_v28 = vadd.f32 %v1510_v16, %v1488_v25  ;;  %v1576_v16 = vld [vmem:[%s3028_s11 + $0x8] sm:$0xff] }
 0x798   : > { %v1846_v21 = vmul.f32 -1.442695, %v1511_v28 }
 0x799   : > { %v1530_v24 = vpop.f32.mrf.mxu1 }
 0x79a   : > { %2158 = vpow2.f32 %v1846_v21  ;;  %v2905_v8 = vadd.f32 %v1530_v24, %v1488_v25  ;;  %v1575_v25 = vld [vmem:[%s3028_s11] sm:$0xff] }
 0x79b   : > { %2160 = vrcp.f32 %v2903_v19 }
 0x79c   : > { %v1847_v30 = vmul.f32 -1.442695, %v2905_v8 }
 0x79e   : > { %2162 = vpow2.f32 %v1847_v30 }
 0x79f   : > { %2164 = vrcp.f32 %v2907_v9 }
 0x7a0   : > { %v2159_v54 = vpop.eup %2158 }
 0x7a1   : > { %v1539_v31 = vadd.f32 1.0, %v2159_v54  ;;  %v2161_v52 = vpop.eup %2160 }
 0x7a2   : > { %v566_v34 = vmul.f32 %v2161_v52, %v2903_v19  ;;  %vm571_vm13 = vweird.f32 %v2161_v52 }
 0x7a3   : > { %2166 = vrcp.f32 %v1539_v31  ;;  %v1550_v44 = vand.u32 2147483647, %v1539_v31  ;;  %v1552_v45 = vand.u32 2147483648, %v1539_v31  ;;  %vm1546_vm1 = vweird.f32 %v1539_v31  ;;  %vm2926_vm12 = vmor %vm570_vm8, %vm571_vm13 }
 0x7a4   : > { %v2163_v32 = vpop.eup %2162  ;;  %v567_v38 = vsub.f32 1.0, %v566_v34 }
 0x7a5   : > { %v2912_v33 = vpop.eup %2164  ;;  %v1540_v36 = vadd.f32 1.0, %v2163_v32  ;;  %vm1551_vm3 = vcmp.eq.f32.partialorder %v1550_v44, 8.507059e+37  ;;  %v1553_v55 = vor.u32 1.1754944e-38, %v1552_v45 }
 0x7a6   : > { %v581_v37 = vmul.f32 %v2912_v33, %v2907_v9  ;;  %v568_v43 = vmul.f32 %v2161_v52, %v567_v38  ;;  %vm586_vm11 = vweird.f32 %v2912_v33 }
 0x7a7   : > { %2168 = vrcp.f32 %v1540_v36  ;;  %v1567_v60 = vand.u32 2147483648, %v1540_v36  ;;  %v1565_v0 = vand.u32 2147483647, %v1540_v36  ;;  %vm1561_vm14 = vweird.f32 %v1540_v36  ;;  %vm587_vm5 = vmor %vm585_vm10, %vm586_vm11 }
 0x7a8   : > { %v582_v40 = vsub.f32 1.0, %v581_v37  ;;  %v569_v53 = vadd.f32 %v2161_v52, %v568_v43 }
 0x7a9   : > { %v2167_v48 = vpop.eup %2166  ;;  %v1568_v5 = vor.u32 1.1754944e-38, %v1567_v60  ;;  %vm1566_vm0 = vcmp.eq.f32.partialorder %v1565_v0, 8.507059e+37 }
 0x7aa   : > { %v1542_v39 = vmul.f32 %v2167_v48, %v1539_v31  ;;  %vm1547_vm7 = vweird.f32 %v2167_v48  ;;  %v583_v50 = vmul.f32 %v2912_v33, %v582_v40  ;;  %v573_v4 = vsel %vm2926_vm12, %v2161_v52, %v569_v53 }
 0x7ab   : > { %vm1548_vm2 = vmor %vm1546_vm1, %vm1547_vm7  ;;  %v578_v13 = vsel %vm575_vm4, %v577_v6, %v573_v4  ;;  %vm1589_vm7 = vcmask 195584  }
 0x7ac   : > { %v1543_v41 = vsub.f32 1.0, %v1542_v39  ;;  %v584_v63 = vadd.f32 %v2912_v33, %v583_v50  ;;  %v625_v35 = vmul.f32 %v578_v13, %v2896_v57 }
 0x7ad   : > { %v2169_v42 = vpop.eup %2168 }
 0x7ae   : > { %v1544_v46 = vmul.f32 %v2167_v48, %v1543_v41  ;;  %v1557_v47 = vmul.f32 %v2169_v42, %v1540_v36  ;;  %vm1562_vm9 = vweird.f32 %v2169_v42  ;;  %v588_v22 = vsel %vm587_vm5, %v2912_v33, %v584_v63 }
 0x7af   : > { %vm1563_vm15 = vmor %vm1561_vm14, %vm1562_vm9  ;;  %v593_v26 = vsel %vm590_vm6, %v592_v27, %v588_v22 }
 0x7b0   : > { %v1545_v51 = vadd.f32 %v2167_v48, %v1544_v46  ;;  %v1558_v59 = vsub.f32 1.0, %v1557_v47 }
 0x7b2   : > { %v1549_v61 = vsel %vm1548_vm2, %v2167_v48, %v1545_v51  ;;  %v1559_v62 = vmul.f32 %v2169_v42, %v1558_v59 }
 0x7b3   : > { %v1554_v7 = vsel %vm1551_vm3, %v1553_v55, %v1549_v61 }
 0x7b4   : > { %v1571_v58 = vmul.f32 %v1554_v7, %v1511_v28  ;;  %v1560_v23 = vadd.f32 %v2169_v42, %v1559_v62  ;;  %v626_v28 = vmul.f32 %v593_v26, %v2899_v17 }
 0x7b6   : > { %v1573_v11 = vadd.f32 %v1571_v58, %v2719_v12  ;;  %v1564_v14 = vsel %vm1563_vm15, %v2169_v42, %v1560_v23 }
 0x7b7   : > { %v1569_v15 = vsel %vm1566_vm0, %v1568_v5, %v1564_v14 }
 0x7b8   : > { %v1572_v18 = vmul.f32 %v1569_v15, %v2905_v8  ;;  %1609 = vmatpush.msrb.mxu0 %v1573_v11  ;;  %1863 = vmatpush.msra.mxu2 %v1573_v11  ;;  %v1587_v8 = vpop.permute.xlu0 %1586 }
 0x7ba   : > { %v1574_v29 = vadd.f32 %v1572_v18, %v2724_v20  ;;  %1610 = vmatpush.msrb.mxu0 %v2719_v12  ;;  %1864 = vmatpush.msra.mxu2 %v2719_v12  ;;  %v1582_v12 = vpop.permute.xlu2 %1581 }
 0x7bc   : > { %1632 = vmatpush.msrb.mxu1 %v1574_v29  ;;  %1866 = vmatpush.msra.mxu3 %v1574_v29 }
 0x7bd   : > { %1611 = vmatpush.msrb.mxu0 %v625_v35  ;;  %1865 = vmatpush.msra.mxu2 %v625_v35 }
 0x7be   : > { %1633 = vmatpush.msrb.mxu1 %v2724_v20  ;;  %1867 = vmatpush.msra.mxu3 %v2724_v20 }
 0x7bf   : > { %1848 = vmatmul.msk.f32.vlgmr.msrb.gmra.mxu0 %vm1589_vm7, %v1575_v25  ;;  %1849 = vmatmul.msk.f32.vlgmr.msra.gmra.mxu2 %vm1589_vm7, %v1576_v16 }
 0x7c0   : > { %1634 = vmatpush.msrb.mxu1 %v626_v28  ;;  %1868 = vmatpush.msra.mxu3 %v626_v28 }
 0x7c1   : > { %1850 = vmatmul.msk.f32.vlgmr.msrb.gmra.mxu1 %vm1589_vm7, %v1575_v25  ;;  %1851 = vmatmul.msk.f32.vlgmr.msra.gmra.mxu3 %vm1589_vm7, %v1576_v16 }
 0x83c   : > { %v1613_v57 = vpop.f32.mrf.mxu0 }
 0x83d   : > { %v1614_v56 = vadd.f32 %v1613_v57, %v1582_v12 }
 0x83e   : > { %v1636_v19 = vpop.f32.mrf.mxu1 }
 0x83f   : > { %v1852_v21 = vmul.f32 -1.442695, %v1614_v56  ;;  %v2955_v24 = vadd.f32 %v1636_v19, %v1582_v12 }
 0x841   : > { %2170 = vpow2.f32 %v1852_v21  ;;  %v1853_v17 = vmul.f32 -1.442695, %v2955_v24 }
 0x842   : > { %v1616_v9 = vpop.f32.mrf.mxu2 }
 0x843   : > { %2172 = vpow2.f32 %v1853_v17  ;;  %v2958_v20 = vadd.f32 %v1616_v9, %v1587_v8 }
 0x844   : > { %v1639_v30 = vpop.f32.mrf.mxu3 }
 0x845   : > { %v1854_v54 = vmul.f32 -1.442695, %v2958_v20  ;;  %v2961_v31 = vadd.f32 %v1639_v30, %v1587_v8 }
 0x847   : > { %v2171_v52 = vpop.eup %2170  ;;  %2174 = vpow2.f32 %v1854_v54  ;;  %v1855_v32 = vmul.f32 -1.442695, %v2961_v31 }
 0x848   : > { %v1654_v33 = vadd.f32 1.0, %v2171_v52 }
 0x849   : > { %v2173_v34 = vpop.eup %2172  ;;  %2176 = vpow2.f32 %v1855_v32 }
 0x84a   : > { %2178 = vrcp.f32 %v1654_v33  ;;  %v1655_v36 = vadd.f32 1.0, %v2173_v34  ;;  %v1667_v44 = vand.u32 2147483647, %v1654_v33  ;;  %v1669_v45 = vand.u32 2147483648, %v1654_v33 }
 0x84b   : > { %vm1663_vm13 = vweird.f32 %v1654_v33 }
 0x84c   : > { %2180 = vrcp.f32 %v1655_v36  ;;  %v1684_v51 = vand.u32 2147483648, %v1655_v36  ;;  %vm1668_vm1 = vcmp.eq.f32.partialorder %v1667_v44, 8.507059e+37  ;;  %v1670_v55 = vor.u32 1.1754944e-38, %v1669_v45 }
 0x84d   : > { %v2175_v37 = vpop.eup %2174  ;;  %v1682_v61 = vand.u32 2147483647, %v1655_v36  ;;  %vm1678_vm9 = vweird.f32 %v1655_v36 }
 0x84e   : > { %v1656_v48 = vadd.f32 1.0, %v2175_v37  ;;  %v1685_v58 = vor.u32 1.1754944e-38, %v1684_v51 }
 0x84f   : > { %v2177_v38 = vpop.eup %2176  ;;  %vm1683_vm12 = vcmp.eq.f32.partialorder %v1682_v61, 8.507059e+37 }
 0x850   : > { %v2179_v39 = vpop.eup %2178  ;;  %2182 = vrcp.f32 %v1656_v48  ;;  %v2964_v41 = vadd.f32 1.0, %v2177_v38  ;;  %v1699_v7 = vand.u32 2147483648, %v1656_v48  ;;  %v1697_v3 = vand.u32 2147483647, %v1656_v48 }
 0x851   : > { %v1659_v40 = vmul.f32 %v2179_v39, %v1654_v33  ;;  %vm1664_vm8 = vweird.f32 %v2179_v39  ;;  %vm1693_vm14 = vweird.f32 %v1656_v48 }
 0x852   : > { %v2181_v42 = vpop.eup %2180  ;;  %2184 = vrcp.f32 %v2964_v41  ;;  %vm1665_vm2 = vmor %vm1663_vm13, %vm1664_vm8  ;;  %v1700_v15 = vor.u32 1.1754944e-38, %v1699_v7  ;;  %v1714_v13 = vand.u32 2147483648, %v2964_v41  ;;  %v1712_v27 = vand.u32 2147483647, %v2964_v41 }
 0x853   : > { %v1660_v43 = vsub.f32 1.0, %v1659_v40  ;;  %v1674_v46 = vmul.f32 %v2181_v42, %v1655_v36  ;;  %vm1679_vm3 = vweird.f32 %v2181_v42  ;;  %vm1698_vm4 = vcmp.eq.f32.partialorder %v1697_v3, 8.507059e+37 }
 0x854   : > { %vm1680_vm10 = vmor %vm1678_vm9, %vm1679_vm3  ;;  %vm1708_vm5 = vweird.f32 %v2964_v41  ;;  %v1715_v16 = vor.u32 1.1754944e-38, %v1714_v13  ;;  %vm1713_vm7 = vcmp.eq.f32.partialorder %v1712_v27, 8.507059e+37 }
 0x855   : > { %v1661_v47 = vmul.f32 %v2179_v39, %v1660_v43  ;;  %v1675_v50 = vsub.f32 1.0, %v1674_v46 }
 0x856   : > { %v2183_v49 = vpop.eup %2182 }
 0x857   : > { %v1662_v59 = vadd.f32 %v2179_v39, %v1661_v47  ;;  %v1689_v53 = vmul.f32 %v2183_v49, %v1656_v48  ;;  %v1676_v60 = vmul.f32 %v2181_v42, %v1675_v50  ;;  %vm1694_vm11 = vweird.f32 %v2183_v49 }
 0x858   : > { %v2185_v62 = vpop.eup %2184  ;;  %vm1695_vm15 = vmor %vm1693_vm14, %vm1694_vm11 }
 0x859   : > { %v1666_v0 = vsel %vm1665_vm2, %v2179_v39, %v1662_v59  ;;  %v1690_v2 = vsub.f32 1.0, %v1689_v53  ;;  %v1677_v63 = vadd.f32 %v2181_v42, %v1676_v60  ;;  %v1704_v23 = vmul.f32 %v2185_v62, %v2964_v41 }
 0x85a   : > { %v1671_v10 = vsel %vm1668_vm1, %v1670_v55, %v1666_v0  ;;  %vm1709_vm0 = vweird.f32 %v2185_v62 }
 0x85b   : > { %v1718_v4 = vmul.f32 %v1671_v10, %v1614_v56  ;;  %v1691_v1 = vmul.f32 %v2183_v49, %v1690_v2  ;;  %v1681_v5 = vsel %vm1680_vm10, %v2181_v42, %v1677_v63  ;;  %v1705_v6 = vsub.f32 1.0, %v1704_v23  ;;  %vm1710_vm6 = vmor %vm1708_vm5, %vm1709_vm0 }
 0x85c   : > { %v1686_v11 = vsel %vm1683_vm12, %v1685_v58, %v1681_v5 }
 0x85d   : > { %1722 = vst [vmem:[%s2971_s25] sm:$0xff] %v1718_v4  ;;  %v1692_v14 = vadd.f32 %v2183_v49, %v1691_v1  ;;  %v1719_v22 = vmul.f32 %v1686_v11, %v2955_v24  ;;  %v1706_v18 = vmul.f32 %v2185_v62, %v1705_v6 }
 0x85f   : > { %v1696_v29 = vsel %vm1695_vm15, %v2183_v49, %v1692_v14  ;;  %1723 = vst [vmem:[%s2971_s25 + $0x8] sm:$0xff] %v1719_v22  ;;  %v1707_v35 = vadd.f32 %v2185_v62, %v1706_v18 }
 0x860   : > { %v1701_v26 = vsel %vm1698_vm4, %v1700_v15, %v1696_v29 }
 0x861   : > { %v1720_v25 = vmul.f32 %v1701_v26, %v2958_v20  ;;  %v1711_v28 = vsel %vm1710_vm6, %v2185_v62, %v1707_v35 }
 0x862   : > { %v1716_v12 = vsel %vm1713_vm7, %v1715_v16, %v1711_v28 }
 0x863   : > { %1724 = vst [vmem:[%s2971_s25 + $0x10] sm:$0xff] %v1720_v25  ;;  %v1721_v57 = vmul.f32 %v1716_v12, %v2961_v31 }
 0x865   : > { %1725 = vst [vmem:[%s2971_s25 + $0x18] sm:$0xff] %v1721_v57 }
 0x866   : > { %2243 = shalt.err (!%p2240_p4)
}
 0x867   : > { %s2302_s30 = smov 256  }
 0x868   : > { %1871 = dma.vmem_to_hbm [thread:$0]  (%p2423_p11), %s1740_s19, 512, %s1742_s23, %s1727_s18, %s2302_s30, %s2302_s30, %s2291_s22  }
 0x869 PF: > { %s3078_s25 = sld [smem:[#allocation9_spill]]  ;;  %p3080_p7 = scmp.ge.s32.totalorder %s2282_s28, 2 }
 0x86b   : > { %p1878_p5 = pnand %p3080_p7, %p2427_p12 }
 0x86d   : > { %p1879_p8 = pneg %p1878_p5 }
 0x86f   : > { %s1756_s0 = sand.u32 1, %s3078_s25  }
 0x870   : > { %s1757_s15 = scalar_lea.sflag [#allocation5], %s1756_s0 }
 0x871   : > { %2265 = dma.done.wait (%p1879_p8), %s1757_s15, 512  }
 0x872   : > { %2267 = vsyncadd (%p1879_p8), %s1757_s15, 4294966784  ;;  %s3081_s28 = sld [smem:[#allocation11_spill]]  ;;  %s3084_s25 = smov %s2274_s26 }
 0x873   : > { %s3082_s16 = sld [smem:[#allocation10_spill]] }
 0x874   : > { %s3083_s27 = sld [smem:[#allocation12_spill]] }
 0x878   : > { %p26_p10 = scmp.ge.s32.totalorder %s3081_s28, 4  }
 0x879   : > { %s3085_s26 = smov %s3082_s16 }
 0x87a   :  { %28 = sbr.rel (!%p26_p10) target bundleno = 8 (0x8), region = 117 }
 0x87f   :  { %1763 = vsyncpa [#allocation4], 1 }
 0x880   :  { %1765 = vsyncpa [#allocation4 + $0x1], 1 }
 0x881   :  { %1766 = vsyncpa [#allocation5], 1 }
 0x882   :  { %1768 = vsyncpa [#allocation5 + $0x1], 1 }

</bundles_post_ra>
